<compile_context>
chip_gen: v7x
topology: tpu7x:2x2x1
jax: 0.10.0
libtpu: 0.0.40
codegen_flags: <defaults>
</compile_context>

<pallas_src>
import jax
import jax.numpy as jnp
from jax.experimental import pallas as pl
from jax.experimental.pallas import tpu as pltpu


def _round_up(v, m):
    return ((v + m - 1) // m) * m


# ---------------------------------------------------------------------------
# Fused kernel:
#   conv stack (k -> 64 -> 128 -> 1024) tiled over points, running max-pool,
#   then (on the last N-tile) conv3 BN-shift + ReLU and the FC stack.
# grid = (B, N_pad // TN); x block = (1, TN, k); out block = (1, 1, kk_pad).
# ---------------------------------------------------------------------------
def tnet_kernel(x_ref,
                w1_ref, b1_ref, w2_ref, b2_ref, w3_ref, b3_ref,
                w4_ref, b4_ref, w5_ref, b5_ref, w6_ref, eye_ref,
                out_ref, acc_ref):
    n = pl.program_id(1)

    @pl.when(n == 0)
    def _init():
        acc_ref[...] = jnp.full(acc_ref.shape, -jnp.inf, dtype=jnp.float32)

    x = x_ref[0]                                                    # (TN, k) bf16

    # conv_block1: Conv1d(k, 64, 1, bias=False) + BN(folded) + ReLU
    h = jnp.dot(x, w1_ref[...], preferred_element_type=jnp.float32)
    h = jnp.maximum(h + b1_ref[...], 0.0)                           # (TN, 64) f32

    # conv_block2: Conv1d(64, 128, 1, bias=False) + BN(folded) + ReLU
    h = jnp.dot(h.astype(w2_ref.dtype), w2_ref[...],
                preferred_element_type=jnp.float32)
    h = jnp.maximum(h + b2_ref[...], 0.0)                           # (TN, 128) f32

    # conv_block3 matmul only: BN shift + ReLU commute with the max over
    # points, so they are hoisted out of the tile loop (applied once below).
    h = jnp.dot(h.astype(w3_ref.dtype), w3_ref[...],
                preferred_element_type=jnp.float32)                 # (TN, 1024) f32

    # running max over point tiles (torch.max(x, 2))
    acc_ref[...] = jnp.maximum(acc_ref[...],
                               jnp.max(h, axis=0, keepdims=True))   # (1, 1024)

    @pl.when(n == pl.num_programs(1) - 1)
    def _finish():
        # hoisted conv_block3 BN shift + ReLU on the pooled vector
        g = jnp.maximum(acc_ref[...] + b3_ref[...], 0.0)            # (1, 1024) f32

        # linear_block1: Linear(1024, 512, bias=False) + BN(folded) + ReLU
        f = jnp.dot(g.astype(w4_ref.dtype), w4_ref[...],
                    preferred_element_type=jnp.float32)
        f = jnp.maximum(f + b4_ref[...], 0.0)                       # (1, 512)

        # linear_block2: Linear(512, 256, bias=False) + BN(folded) + ReLU
        f = jnp.dot(f.astype(w5_ref.dtype), w5_ref[...],
                    preferred_element_type=jnp.float32)
        f = jnp.maximum(f + b5_ref[...], 0.0)                       # (1, 256)

        # linear_block3: Linear(256, k*k) (lane-padded), + eye(k)
        o = jnp.dot(f.astype(w6_ref.dtype), w6_ref[...],
                    preferred_element_type=jnp.float32)             # (1, kk_pad)
        out_ref[0] = o + eye_ref[...]


# ---------------------------------------------------------------------------
# Wrapper
# ---------------------------------------------------------------------------
def tnet_forward(x_bkn, params, k, tile_n=2048):
    """x_bkn: (B, k, N) float32 (NCW, like PyTorch Conv1d) -> (B, k, k) f32."""
    B, kk, N = x_bkn.shape
    assert kk == k
    (w1, b1, w2, b2, w3, b3, w4, b4, w5, b5, w6p, eyep) = params
    kk_pad = eyep.shape[1]

    # Point tile: multiple of 16 (bf16 sublane packing), capped at tile_n.
    tn = min(_round_up(max(int(tile_n), 16), 16), _round_up(N, 16))
    n_pad = _round_up(N, tn)

    # channels-last, bf16 activations (f32 accumulation inside the kernel)
    x = jnp.transpose(x_bkn, (0, 2, 1)).astype(jnp.bfloat16)        # (B, N, k)
    if n_pad != N:
        # Pad with duplicates of point 0: exact for a max-pool over points
        # (zero padding would NOT be safe — fake points could win the max).
        pad = jnp.broadcast_to(x[:, :1, :], (B, n_pad - N, k))
        x = jnp.concatenate([x, pad], axis=1)                       # (B, N_pad, k)

    def full_spec(arr):
        nd = arr.ndim
        return pl.BlockSpec(arr.shape, lambda b, n, _nd=nd: (0,) * _nd)

    out = pl.pallas_call(
        tnet_kernel,
        out_shape=jax.ShapeDtypeStruct((B, 1, kk_pad), jnp.float32),
        grid=(B, n_pad // tn),
        in_specs=[pl.BlockSpec((1, tn, k), lambda b, n: (b, n, 0))]
                 + [full_spec(a) for a in (w1, b1, w2, b2, w3, b3,
                                           w4, b4, w5, b5, w6p, eyep)],
        out_specs=pl.BlockSpec((1, 1, kk_pad), lambda b, n: (b, 0, 0)),
        scratch_shapes=[pltpu.VMEM((1, 1024), jnp.float32)],
        compiler_params=pltpu.CompilerParams(
            dimension_semantics=("parallel", "arbitrary"),
            # <= 48 MiB keeps headroom on v7x's 64 MiB VMEM; ~15 MiB needed at TN=2048.
            vmem_limit_bytes=48 * 1024 * 1024),
    )(x, w1, b1, w2, b2, w3, b3, w4, b4, w5, b5, w6p, eyep)

    return out.reshape(B, kk_pad)[:, :k * k].reshape(B, k, k)


# ---------------------------------------------------------------------------
# Parameters: synthetic, BN folded into weights, weights cast to bf16.
# ---------------------------------------------------------------------------
def make_params(key, k):
    eps = 1e-5
    kk_pad = ((k * k + 127) // 128) * 128
    dims = [(k, 64), (64, 128), (128, 1024), (1024, 512), (512, 256), (256, k * k)]
    keys = jax.random.split(key, 6 * 5)
    params = []
    ki = 0
    for i, (cin, cout) in enumerate(dims):
        w = 0.1 * jax.random.normal(keys[ki], (cin, cout), jnp.float32); ki += 1
        if i < 5:   # blocks 1..5 have BatchNorm (eval-mode, folded)
            gamma = 1.0 + 0.1 * jax.random.normal(keys[ki], (1, cout), jnp.float32); ki += 1
            beta = 0.1 * jax.random.normal(keys[ki], (1, cout), jnp.float32); ki += 1
            mean = 0.1 * jax.random.normal(keys[ki], (1, cout), jnp.float32); ki += 1
            var = jnp.abs(jax.random.normal(keys[ki], (1, cout), jnp.float32)) + 0.5; ki += 1
            scale = gamma / jnp.sqrt(var + eps)
            shift = beta - mean * scale
            w_folded = (w * scale).astype(jnp.bfloat16)              # fold BN scale
            params.extend([w_folded, shift.astype(jnp.float32)])
        else:       # final Linear(256, k*k), no BN/ReLU; pad to lane-dense width
            w_pad = jnp.zeros((cin, kk_pad), jnp.float32)
            w_pad = w_pad.at[:, :k * k].set(w).astype(jnp.bfloat16)
            params.append(w_pad)
    eye_pad = jnp.zeros((1, kk_pad), jnp.float32)
    eye_pad = eye_pad.at[0, :k * k].set(jnp.eye(k, dtype=jnp.float32).reshape(-1))
    params.append(eye_pad)
    return tuple(params)


# ---------------------------------------------------------------------------
# Pure-JAX reference (same bf16-operand / f32-accumulate arithmetic, original
# PyTorch op order: per-point bias+ReLU, then max over points).
# ---------------------------------------------------------------------------
def ref_forward(x_bkn, params, k):
    (w1, b1, w2, b2, w3, b3, w4, b4, w5, b5, w6p, eyep) = params
    B = x_bkn.shape[0]
    x = jnp.transpose(x_bkn, (0, 2, 1))                             # (B, N, k)

    def block(h, w, b):
        y = jnp.dot(h.astype(jnp.bfloat16), w,
                    preferred_element_type=jnp.float32)
        return jnp.maximum(y + b, 0.0)

    h = block(x, w1, b1)
    h = block(h, w2, b2)
    h = block(h, w3, b3)
    g = jnp.max(h, axis=1)                                          # (B, 1024)

    f = block(g, w4, b4)
    f = block(f, w5, b5)
    o = jnp.dot(f.astype(jnp.bfloat16), w6p,
                preferred_element_type=jnp.float32) + eyep          # (B, kk_pad)
    return o[:, :k * k].reshape(B, k, k)


if __name__ == "__main__":
    B, k, N = 2, 3, 40          # N=40 exercises the ragged (padded) last tile
    key = jax.random.PRNGKey(0)
    k_x, k_p = jax.random.split(key)
    x = jax.random.normal(k_x, (B, k, N), jnp.float32)   # NCW, like PyTorch Conv1d input
    params = make_params(k_p, k)

    # tile_n=16 -> 3 point tiles (last one padded with duplicate points):
    # exercises init / running-max / final FC-fusion paths.
    out = tnet_forward(x, params, k, tile_n=16)
    out = jax.block_until_ready(out)

    # default (large) tile -> single-tile path
    out_single = jax.block_until_ready(tnet_forward(x, params, k))

    ref = ref_forward(x, params, k)
    assert out.shape == (B, k, k)
    assert jnp.allclose(out, ref, atol=1e-2, rtol=1e-2), "mismatch vs JAX reference"
    assert jnp.allclose(out_single, ref, atol=1e-2, rtol=1e-2), "mismatch vs JAX reference"
    print("KERNEL_OK")
</pallas_src>

<mosaic_0001>
module attributes {stable_mosaic.version = 11 : i64} {
  func.func @tnet_kernel(%arg0: i32, %arg1: i32, %arg2: memref<1x16x3xbf16, #tpu.memory_space<vmem>>, %arg3: memref<3x64xbf16, #tpu.memory_space<vmem>>, %arg4: memref<1x64xf32, #tpu.memory_space<vmem>>, %arg5: memref<64x128xbf16, #tpu.memory_space<vmem>>, %arg6: memref<1x128xf32, #tpu.memory_space<vmem>>, %arg7: memref<128x1024xbf16, #tpu.memory_space<vmem>>, %arg8: memref<1x1024xf32, #tpu.memory_space<vmem>>, %arg9: memref<1024x512xbf16, #tpu.memory_space<vmem>>, %arg10: memref<1x512xf32, #tpu.memory_space<vmem>>, %arg11: memref<512x256xbf16, #tpu.memory_space<vmem>>, %arg12: memref<1x256xf32, #tpu.memory_space<vmem>>, %arg13: memref<256x128xbf16, #tpu.memory_space<vmem>>, %arg14: memref<1x128xf32, #tpu.memory_space<vmem>>, %arg15: memref<1x1x128xf32, #tpu.memory_space<vmem>>, %arg16: memref<1x1024xf32, #tpu.memory_space<vmem>>) attributes {dimension_semantics = [#tpu.dimension_semantics<parallel>, #tpu.dimension_semantics<arbitrary>], iteration_bounds = array<i64: 2, 3>, scalar_prefetch = 0 : i64, scratch_operands = 1 : i64, tpu.core_type = #tpu.core_type<tc>, window_params = [{transform_indices = @transform_0, window_bounds = array<i64: 1, 16, 3>}, {pipeline_mode = #tpu.pipeline_mode<synchronous>, transform_indices = @transform_1, window_bounds = array<i64: 3, 64>}, {pipeline_mode = #tpu.pipeline_mode<synchronous>, transform_indices = @transform_2, window_bounds = array<i64: 1, 64>}, {pipeline_mode = #tpu.pipeline_mode<synchronous>, transform_indices = @transform_3, window_bounds = array<i64: 64, 128>}, {pipeline_mode = #tpu.pipeline_mode<synchronous>, transform_indices = @transform_4, window_bounds = array<i64: 1, 128>}, {pipeline_mode = #tpu.pipeline_mode<synchronous>, transform_indices = @transform_5, window_bounds = array<i64: 128, 1024>}, {pipeline_mode = #tpu.pipeline_mode<synchronous>, transform_indices = @transform_6, window_bounds = array<i64: 1, 1024>}, {pipeline_mode = #tpu.pipeline_mode<synchronous>, transform_indices = @transform_7, window_bounds = array<i64: 1024, 512>}, {pipeline_mode = #tpu.pipeline_mode<synchronous>, transform_indices = @transform_8, window_bounds = array<i64: 1, 512>}, {pipeline_mode = #tpu.pipeline_mode<synchronous>, transform_indices = @transform_9, window_bounds = array<i64: 512, 256>}, {pipeline_mode = #tpu.pipeline_mode<synchronous>, transform_indices = @transform_10, window_bounds = array<i64: 1, 256>}, {pipeline_mode = #tpu.pipeline_mode<synchronous>, transform_indices = @transform_11, window_bounds = array<i64: 256, 128>}, {pipeline_mode = #tpu.pipeline_mode<synchronous>, transform_indices = @transform_12, window_bounds = array<i64: 1, 128>}, {transform_indices = @transform_13, window_bounds = array<i64: 1, 1, 128>}]} {
    %c0_i32 = arith.constant 0 : i32
    %0 = arith.cmpi eq, %arg1, %c0_i32 : i32
    %1 = arith.extui %0 : i1 to i32
    %c0_i32_0 = arith.constant 0 : i32
    %2 = arith.cmpi ne, %1, %c0_i32_0 : i32
    scf.if %2 {
      %cst_23 = arith.constant 0xFF800000 : f32
      %31 = vector.broadcast %cst_23 : f32 to vector<1x1024xf32>
      %c0_24 = arith.constant 0 : index
      %c0_25 = arith.constant 0 : index
      %32 = vector.load %arg16[%c0_24, %c0_25] : memref<1x1024xf32, #tpu.memory_space<vmem>>, vector<1x1024xf32>
      tpu.vector_store %arg16[%c0_24, %c0_25], %31 {strides = array<i32>} : memref<1x1024xf32, #tpu.memory_space<vmem>>, vector<1x1024xf32>,
    } else {
    }
    %c0 = arith.constant 0 : index
    %c0_1 = arith.constant 0 : index
    %c0_2 = arith.constant 0 : index
    %3 = vector.load %arg2[%c0, %c0_1, %c0_2] : memref<1x16x3xbf16, #tpu.memory_space<vmem>>, vector<1x16x3xbf16>
    %4 = vector.shape_cast %3 : vector<1x16x3xbf16> to vector<16x3xbf16>
    %c0_3 = arith.constant 0 : index
    %c0_4 = arith.constant 0 : index
    %5 = vector.load %arg3[%c0_3, %c0_4] : memref<3x64xbf16, #tpu.memory_space<vmem>>, vector<3x64xbf16>
    %cst = arith.constant dense<0.000000e+00> : vector<16x64xf32>
    %6 = tpu.matmul %4, %5, %cst {dimension_numbers = #tpu.dot_dimension_numbers<[1], [0], [0], [1], [0, 0, 1, 1], [], []>} : vector<16x3xbf16>, vector<3x64xbf16>, vector<16x64xf32> -> vector<16x64xf32>
    %c0_5 = arith.constant 0 : index
    %c0_6 = arith.constant 0 : index
    %7 = vector.load %arg4[%c0_5, %c0_6] : memref<1x64xf32, #tpu.memory_space<vmem>>, vector<1x64xf32>
    %8 = vector.broadcast %7 : vector<1x64xf32> to vector<16x64xf32>
    %9 = arith.addf %6, %8 : vector<16x64xf32>
    %cst_7 = arith.constant 0.000000e+00 : f32
    %10 = vector.broadcast %cst_7 : f32 to vector<16x64xf32>
    %11 = arith.maximumf %9, %10 : vector<16x64xf32>
    %12 = arith.truncf %11 : vector<16x64xf32> to vector<16x64xbf16>
    %c0_8 = arith.constant 0 : index
    %c0_9 = arith.constant 0 : index
    %13 = vector.load %arg5[%c0_8, %c0_9] : memref<64x128xbf16, #tpu.memory_space<vmem>>, vector<64x128xbf16>
    %cst_10 = arith.constant dense<0.000000e+00> : vector<16x128xf32>
    %14 = tpu.matmul %12, %13, %cst_10 {dimension_numbers = #tpu.dot_dimension_numbers<[1], [0], [0], [1], [0, 0, 1, 1], [], []>} : vector<16x64xbf16>, vector<64x128xbf16>, vector<16x128xf32> -> vector<16x128xf32>
    %c0_11 = arith.constant 0 : index
    %c0_12 = arith.constant 0 : index
    %15 = vector.load %arg6[%c0_11, %c0_12] : memref<1x128xf32, #tpu.memory_space<vmem>>, vector<1x128xf32>
    %16 = vector.broadcast %15 : vector<1x128xf32> to vector<16x128xf32>
    %17 = arith.addf %14, %16 : vector<16x128xf32>
    %cst_13 = arith.constant 0.000000e+00 : f32
    %18 = vector.broadcast %cst_13 : f32 to vector<16x128xf32>
    %19 = arith.maximumf %17, %18 : vector<16x128xf32>
    %20 = arith.truncf %19 : vector<16x128xf32> to vector<16x128xbf16>
    %c0_14 = arith.constant 0 : index
    %c0_15 = arith.constant 0 : index
    %21 = vector.load %arg7[%c0_14, %c0_15] : memref<128x1024xbf16, #tpu.memory_space<vmem>>, vector<128x1024xbf16>
    %cst_16 = arith.constant dense<0.000000e+00> : vector<16x1024xf32>
    %22 = tpu.matmul %20, %21, %cst_16 {dimension_numbers = #tpu.dot_dimension_numbers<[1], [0], [0], [1], [0, 0, 1, 1], [], []>} : vector<16x128xbf16>, vector<128x1024xbf16>, vector<16x1024xf32> -> vector<16x1024xf32>
    %c0_17 = arith.constant 0 : index
    %c0_18 = arith.constant 0 : index
    %23 = vector.load %arg16[%c0_17, %c0_18] : memref<1x1024xf32, #tpu.memory_space<vmem>>, vector<1x1024xf32>
    %cst_19 = arith.constant dense<0xFF800000> : vector<1024xf32>
    %24 = vector.multi_reduction <maximumf>, %22, %cst_19 [0] : vector<16x1024xf32> to vector<1024xf32>
    %25 = vector.shape_cast %24 : vector<1024xf32> to vector<1x1024xf32>
    %26 = arith.maximumf %23, %25 : vector<1x1024xf32>
    %c0_20 = arith.constant 0 : index
    %c0_21 = arith.constant 0 : index
    %27 = vector.load %arg16[%c0_20, %c0_21] : memref<1x1024xf32, #tpu.memory_space<vmem>>, vector<1x1024xf32>
    tpu.vector_store %arg16[%c0_20, %c0_21], %26 {strides = array<i32>} : memref<1x1024xf32, #tpu.memory_space<vmem>>, vector<1x1024xf32>,
    %c2_i32 = arith.constant 2 : i32
    %28 = arith.cmpi eq, %arg1, %c2_i32 : i32
    %29 = arith.extui %28 : i1 to i32
    %c0_i32_22 = arith.constant 0 : i32
    %30 = arith.cmpi ne, %29, %c0_i32_22 : i32
    scf.if %30 {
      %c0_23 = arith.constant 0 : index
      %c0_24 = arith.constant 0 : index
      %31 = vector.load %arg16[%c0_23, %c0_24] : memref<1x1024xf32, #tpu.memory_space<vmem>>, vector<1x1024xf32>
      %c0_25 = arith.constant 0 : index
      %c0_26 = arith.constant 0 : index
      %32 = vector.load %arg8[%c0_25, %c0_26] : memref<1x1024xf32, #tpu.memory_space<vmem>>, vector<1x1024xf32>
      %33 = arith.addf %31, %32 : vector<1x1024xf32>
      %cst_27 = arith.constant 0.000000e+00 : f32
      %34 = vector.broadcast %cst_27 : f32 to vector<1x1024xf32>
      %35 = arith.maximumf %33, %34 : vector<1x1024xf32>
      %36 = arith.truncf %35 : vector<1x1024xf32> to vector<1x1024xbf16>
      %c0_28 = arith.constant 0 : index
      %c0_29 = arith.constant 0 : index
      %37 = vector.load %arg9[%c0_28, %c0_29] : memref<1024x512xbf16, #tpu.memory_space<vmem>>, vector<1024x512xbf16>
      %cst_30 = arith.constant dense<0.000000e+00> : vector<1x512xf32>
      %38 = tpu.matmul %36, %37, %cst_30 {dimension_numbers = #tpu.dot_dimension_numbers<[1], [0], [0], [1], [0, 0, 1, 1], [], []>} : vector<1x1024xbf16>, vector<1024x512xbf16>, vector<1x512xf32> -> vector<1x512xf32>
      %c0_31 = arith.constant 0 : index
      %c0_32 = arith.constant 0 : index
      %39 = vector.load %arg10[%c0_31, %c0_32] : memref<1x512xf32, #tpu.memory_space<vmem>>, vector<1x512xf32>
      %40 = arith.addf %38, %39 : vector<1x512xf32>
      %cst_33 = arith.constant 0.000000e+00 : f32
      %41 = vector.broadcast %cst_33 : f32 to vector<1x512xf32>
      %42 = arith.maximumf %40, %41 : vector<1x512xf32>
      %43 = arith.truncf %42 : vector<1x512xf32> to vector<1x512xbf16>
      %c0_34 = arith.constant 0 : index
      %c0_35 = arith.constant 0 : index
      %44 = vector.load %arg11[%c0_34, %c0_35] : memref<512x256xbf16, #tpu.memory_space<vmem>>, vector<512x256xbf16>
      %cst_36 = arith.constant dense<0.000000e+00> : vector<1x256xf32>
      %45 = tpu.matmul %43, %44, %cst_36 {dimension_numbers = #tpu.dot_dimension_numbers<[1], [0], [0], [1], [0, 0, 1, 1], [], []>} : vector<1x512xbf16>, vector<512x256xbf16>, vector<1x256xf32> -> vector<1x256xf32>
      %c0_37 = arith.constant 0 : index
      %c0_38 = arith.constant 0 : index
      %46 = vector.load %arg12[%c0_37, %c0_38] : memref<1x256xf32, #tpu.memory_space<vmem>>, vector<1x256xf32>
      %47 = arith.addf %45, %46 : vector<1x256xf32>
      %cst_39 = arith.constant 0.000000e+00 : f32
      %48 = vector.broadcast %cst_39 : f32 to vector<1x256xf32>
      %49 = arith.maximumf %47, %48 : vector<1x256xf32>
      %50 = arith.truncf %49 : vector<1x256xf32> to vector<1x256xbf16>
      %c0_40 = arith.constant 0 : index
      %c0_41 = arith.constant 0 : index
      %51 = vector.load %arg13[%c0_40, %c0_41] : memref<256x128xbf16, #tpu.memory_space<vmem>>, vector<256x128xbf16>
      %cst_42 = arith.constant dense<0.000000e+00> : vector<1x128xf32>
      %52 = tpu.matmul %50, %51, %cst_42 {dimension_numbers = #tpu.dot_dimension_numbers<[1], [0], [0], [1], [0, 0, 1, 1], [], []>} : vector<1x256xbf16>, vector<256x128xbf16>, vector<1x128xf32> -> vector<1x128xf32>
      %c0_43 = arith.constant 0 : index
      %c0_44 = arith.constant 0 : index
      %53 = vector.load %arg14[%c0_43, %c0_44] : memref<1x128xf32, #tpu.memory_space<vmem>>, vector<1x128xf32>
      %54 = arith.addf %52, %53 : vector<1x128xf32>
      %c0_45 = arith.constant 0 : index
      %c0_46 = arith.constant 0 : index
      %c0_47 = arith.constant 0 : index
      %55 = vector.load %arg15[%c0_45, %c0_46, %c0_47] : memref<1x1x128xf32, #tpu.memory_space<vmem>>, vector<1x1x128xf32>
      %56 = vector.shape_cast %55 : vector<1x1x128xf32> to vector<1x128xf32>
      %57 = vector.shape_cast %54 : vector<1x128xf32> to vector<1x1x128xf32>
      tpu.vector_store %arg15[%c0_45, %c0_46, %c0_47], %57 {strides = array<i32>} : memref<1x1x128xf32, #tpu.memory_space<vmem>>, vector<1x1x128xf32>,
    } else {
    }
    return
  }
  func.func @transform_0(%arg0: i32, %arg1: i32) -> (i32, i32, i32) {
    %c0_i32 = arith.constant 0 : i32
    %c0_i32_0 = arith.constant 0 : i32
    return %arg0, %arg1, %c0_i32 : i32, i32, i32
  }
  func.func @transform_1(%arg0: i32, %arg1: i32) -> (i32, i32) {
    %c0_i32 = arith.constant 0 : i32
    %c0_i32_0 = arith.constant 0 : i32
    %c0_i32_1 = arith.constant 0 : i32
    return %c0_i32, %c0_i32_0 : i32, i32
  }
  func.func @transform_2(%arg0: i32, %arg1: i32) -> (i32, i32) {
    %c0_i32 = arith.constant 0 : i32
    %c0_i32_0 = arith.constant 0 : i32
    %c0_i32_1 = arith.constant 0 : i32
    return %c0_i32, %c0_i32_0 : i32, i32
  }
  func.func @transform_3(%arg0: i32, %arg1: i32) -> (i32, i32) {
    %c0_i32 = arith.constant 0 : i32
    %c0_i32_0 = arith.constant 0 : i32
    %c0_i32_1 = arith.constant 0 : i32
    return %c0_i32, %c0_i32_0 : i32, i32
  }
  func.func @transform_4(%arg0: i32, %arg1: i32) -> (i32, i32) {
    %c0_i32 = arith.constant 0 : i32
    %c0_i32_0 = arith.constant 0 : i32
    %c0_i32_1 = arith.constant 0 : i32
    return %c0_i32, %c0_i32_0 : i32, i32
  }
  func.func @transform_5(%arg0: i32, %arg1: i32) -> (i32, i32) {
    %c0_i32 = arith.constant 0 : i32
    %c0_i32_0 = arith.constant 0 : i32
    %c0_i32_1 = arith.constant 0 : i32
    return %c0_i32, %c0_i32_0 : i32, i32
  }
  func.func @transform_6(%arg0: i32, %arg1: i32) -> (i32, i32) {
    %c0_i32 = arith.constant 0 : i32
    %c0_i32_0 = arith.constant 0 : i32
    %c0_i32_1 = arith.constant 0 : i32
    return %c0_i32, %c0_i32_0 : i32, i32
  }
  func.func @transform_7(%arg0: i32, %arg1: i32) -> (i32, i32) {
    %c0_i32 = arith.constant 0 : i32
    %c0_i32_0 = arith.constant 0 : i32
    %c0_i32_1 = arith.constant 0 : i32
    return %c0_i32, %c0_i32_0 : i32, i32
  }
  func.func @transform_8(%arg0: i32, %arg1: i32) -> (i32, i32) {
    %c0_i32 = arith.constant 0 : i32
    %c0_i32_0 = arith.constant 0 : i32
    %c0_i32_1 = arith.constant 0 : i32
    return %c0_i32, %c0_i32_0 : i32, i32
  }
  func.func @transform_9(%arg0: i32, %arg1: i32) -> (i32, i32) {
    %c0_i32 = arith.constant 0 : i32
    %c0_i32_0 = arith.constant 0 : i32
    %c0_i32_1 = arith.constant 0 : i32
    return %c0_i32, %c0_i32_0 : i32, i32
  }
  func.func @transform_10(%arg0: i32, %arg1: i32) -> (i32, i32) {
    %c0_i32 = arith.constant 0 : i32
    %c0_i32_0 = arith.constant 0 : i32
    %c0_i32_1 = arith.constant 0 : i32
    return %c0_i32, %c0_i32_0 : i32, i32
  }
  func.func @transform_11(%arg0: i32, %arg1: i32) -> (i32, i32) {
    %c0_i32 = arith.constant 0 : i32
    %c0_i32_0 = arith.constant 0 : i32
    %c0_i32_1 = arith.constant 0 : i32
    return %c0_i32, %c0_i32_0 : i32, i32
  }
  func.func @transform_12(%arg0: i32, %arg1: i32) -> (i32, i32) {
    %c0_i32 = arith.constant 0 : i32
    %c0_i32_0 = arith.constant 0 : i32
    %c0_i32_1 = arith.constant 0 : i32
    return %c0_i32, %c0_i32_0 : i32, i32
  }
  func.func @transform_13(%arg0: i32, %arg1: i32) -> (i32, i32, i32) {
    %c0_i32 = arith.constant 0 : i32
    %c0_i32_0 = arith.constant 0 : i32
    %c0_i32_1 = arith.constant 0 : i32
    return %arg0, %c0_i32, %c0_i32_0 : i32, i32, i32
  }
}

</mosaic_0001>

<bundles_post_ra>
// kernel: tpu_custom_call.1
= control target key start
LH: loop header
LB: loop body
LE: loop exit
PB: predicated region body
PF: predicated region fallthrough
CT: control target
= control target key end

     0   :  { %s5892_s0 = inlined_call_operand.vmem [shape: bf16[2,48,3], index: 0, kind: input, shape index: {}]   ;;  %s5893_s1 = inlined_call_operand.vmem [shape: bf16[3,64], index: 1, kind: input, shape index: {}]   ;;  %s5894_s2 = inlined_call_operand.vmem [shape: f32[1,64], index: 2, kind: input, shape index: {}]   ;;  %s5895_s3 = inlined_call_operand.vmem [shape: bf16[64,128], index: 3, kind: input, shape index: {}]   ;;  %s5896_s4 = inlined_call_operand.vmem [shape: f32[1,128], index: 4, kind: input, shape index: {}]   ;;  %s5897_s5 = inlined_call_operand.hbm [shape: bf16[128,1024], index: 5, kind: input, shape index: {}]   ;;  %s5898_s6 = inlined_call_operand.vmem [shape: f32[1,1024], index: 6, kind: input, shape index: {}]   ;;  %s5899_s7 = inlined_call_operand.hbm [shape: bf16[1024,512], index: 7, kind: input, shape index: {}]   ;;  %s5900_s8 = inlined_call_operand.vmem [shape: f32[1,512], index: 8, kind: input, shape index: {}]   ;;  %s5901_s9 = inlined_call_operand.hbm [shape: bf16[512,256], index: 9, kind: input, shape index: {}]   ;;  %s5902_s10 = inlined_call_operand.vmem [shape: f32[1,256], index: 10, kind: input, shape index: {}]   ;;  %s5903_s11 = inlined_call_operand.hbm [shape: bf16[256,128], index: 11, kind: input, shape index: {}]   ;;  %s5904_s12 = inlined_call_operand.vmem [shape: f32[1,128], index: 12, kind: input, shape index: {}]   ;;  %s5905_s13 = inlined_call_operand.hbm [shape: f32[2,1,128], index: 13, kind: output, shape index: {}]  }
   0x1   :  { %5921 = sst [smem:[#allocation26_spill]] %s5900_s8 }
   0x2   :  { %5922 = sst [smem:[#allocation27_spill]] %s5902_s10 }
   0x3   :  { %5923 = sst [smem:[#allocation28_spill]] %s5904_s12 }
   0x4   :  { %5924 = sst [smem:[#allocation29_spill]] %s5905_s13 }
   0x5   :  { %18 = vsyncpa [#allocation4], 0 }
   0x6   :  { %19 = vsyncpa [#allocation7], 0 }
   0x7   :  { %20 = vsyncpa [#allocation10], 0 }
   0x8   :  { %21 = vsyncpa [#allocation5], 0 }
   0x9   :  { %23 = vsyncpa [#allocation5 + $0x1], 0  ;;  %s5535_s25 = smov 0   ;;  %s5537_s26 = smov 0  }
   0xa   :  { %s5539_s27 = smov 0   ;;  %s5541_s28 = smov 0  }
   0xb   :  { %s5543_s29 = smov 0   ;;  %s5545_s30 = smov 0  }
   0xc   :  { %s5547_s14 = smov 0   ;;  %s5549_s15 = smov 0  }
   0xd LB: > { %5925 = sst [smem:[#allocation16_spill]] %s5416_s25  ;;  %s4090_s16 = sadd.s32 4294967295, %s5444_s15   ;;  %s5444_s15 = sphi %s5549_s15, %s29_s15   ;;  %s5440_s14 = sphi %s5547_s14, %s5958_s14   ;;  %s5436_s30 = sphi %s5545_s30, %s5957_s30   ;;  %s5432_s29 = sphi %s5543_s29, %s5956_s29   ;;  %s5428_s28 = sphi %s5541_s28, %s5955_s28   ;;  %s5424_s27 = sphi %s5539_s27, %s5954_s27   ;;  %s5420_s26 = sphi %s5537_s26, %s5960_s26   ;;  %s5416_s25 = sphi %s5535_s25, %s5959_s25  }
   0xe   : > { %5926 = sst [smem:[#allocation17_spill]] %s5424_s27  ;;  %s4091_s17 = sadd.s32 4294967294, %s5444_s15  }
   0xf   : > { %5927 = sst [smem:[#allocation18_spill]] %s5436_s30  ;;  %s38_s18 = sadd.s32 1, %s5436_s30 }
  0x10   : > { %5928 = sst [smem:[#allocation19_spill]] %s5440_s14  ;;  %s41_s19 = sadd.s32 1, %s5440_s14 }
  0x11   : > { %5929 = sst [smem:[#allocation20_spill]] %s5444_s15  ;;  %p39_p0 = scmp.ge.s32.totalorder %s38_s18, 3 }
  0x12   : > { %s328_s20 = sadd.s32 1, %s5424_s27  ;;  %p338_p1 = scmp.ne.s32.totalorder %s5424_s27, %s5420_s26 }
  0x13   : > { %p339_p2 = scmp.eq.s32.totalorder %s4090_s16, 5  ;;  %s5962_s18 = smov (%p39_p0, %s38_s18), 0 }
  0x14   : > { %5930 = sst [smem:[#allocation21_spill]] %s5962_s18  ;;  %s5964_s19 = smov (!%p39_p0, %s41_s19), %s5440_s14 }
  0x15   : > { %p5585_p3 = por %p339_p2, %p338_p1  ;;  %p344_p4 = scmp.ne.s32.totalorder %s5420_s26, %s5416_s25 }
  0x16   : > { %p43_p5 = scmp.ge.s32.totalorder %s5964_s19, 2  ;;  %p345_p6 = scmp.eq.s32.totalorder %s4091_s17, 5 }
  0x17   : > { %s5931_s21 = scalar_select %p5585_p3, 1, 0 }
  0x18   : > { %p4092_p7 = scmp.ge.s32.totalorder %s5444_s15, 1  ;;  %p352_p8 = scmp.lt.s32.totalorder %s5444_s15, 7 }
  0x19   : > { %5932 = sst [smem:[#allocation22_spill]] %s5931_s21  ;;  %s5966_s19 = smov (%p43_p5, %s5964_s19), 0 }
  0x1a   : > { %5933 = sst [smem:[#allocation23_spill]] %s5966_s19  ;;  %p5595_p9 = por %p345_p6, %p344_p4 }
  0x1b   : > { %p5599_p10 = pnand %p4092_p7, %p352_p8  ;;  %s325_s24 = ssub.s32 %s5440_s14, %s5966_s19 }
  0x1c   : > { %s5934_s22 = scalar_select %p5595_p9, 1, 0 }
  0x1d   : > { %s5936_s23 = scalar_select %p5599_p10, 1, 0 }
  0x1e   : > { %5935 = sst [smem:[#allocation24_spill]] %s5934_s22  ;;  %p326_p11 = scmp.eq.s32.totalorder %s325_s24, 0 }
  0x1f   : > { %p4617_p12 = pneg %p5599_p10  ;;  %p5607_p13 = scmp.eq.s32.totalorder %s4090_s16, 0 }
  0x20   : > { %s5612_s18 = scalar_select %p326_p11, %s5424_s27, %s328_s20  }
  0x21   : > { %s5937_s17 = scalar_select %p5607_p13, 1, 0 }
  0x22   : > { %5938 = sst [smem:[#allocation25_spill]] %s5612_s18  ;;  %p5616_p0 = pnand %p5607_p13, %p4617_p12 }
  0x23   : > { %s5446_s22 = smov [#allocation6]   ;;  %s5226_s14 = scalar_lea.hbm %s5899_s7, 32768 }
  0x24   : > { %s392_s25 = sshll.u32 %s5446_s22, 4  ;;  %p5227_p1 = scmp.ne.s32.totalorder %s5899_s7, %s5226_s14  ;;  %s393_s25 = int_to_ptr.vmem [resolvable:$true] %s392_s25 }
  0x25   : > { %p5628_p2 = pneg %p5616_p0  ;;  %p5233_p6 = scmp.lt.u32.totalorder %s5226_s14, %s5899_s7 }
  0x27   : > { %p5229_p4 = pnand %p5628_p2, %p5227_p1 }
  0x29   : > { %p5230_p5 = pneg %p5229_p4 }
  0x2b   : > { %p5235_p7 = pnand %p5233_p6, %p5230_p5 }
  0x2d   : > { %5238 = shalt.err (!%p5235_p7)
}
  0x2e   : > { %s5239_s19 = scalar_lea.vmem %s393_s25, 32768  ;;  %p5247_p9 = scmp.lt.s32.totalorder %s393_s25, %s393_s25 }
  0x2f   : > { %p5240_p8 = scmp.ne.s32.totalorder %s393_s25, %s5239_s19  ;;  %p5248_p3 = scmp.lt.s32.totalorder %s5239_s19, %s5239_s19 }
  0x31   : > { %p5242_p11 = pnand %p5240_p8, %p5628_p2  ;;  %p5249_p13 = por %p5248_p3, %p5247_p9 }
  0x33   : > { %p5243_p12 = pneg %p5242_p11 }
  0x35   : > { %p5250_p10 = pnand %p5249_p13, %p5243_p12 }
  0x37   : > { %5253 = shalt.err (!%p5250_p10)
}
  0x38   : > { %s5447_s15 = smov 256   ;;  %s5448_s24 = smov 16  }
  0x39   : > { %4623 = dma.hbm_to_vmem [thread:$0]  (!%p5616_p0), %s5899_s7, 32768, %s393_s25, [#allocation7], %s5447_s15, %s5447_s15, %s5448_s24  }
  0x3a   : > { %s5449_s16 = smov [#allocation3]   ;;  %s5254_s21 = scalar_lea.hbm %s5897_s5, 8192 }
  0x3b   : > { %s376_s22 = sshll.u32 %s5449_s16, 4  ;;  %p5255_p3 = scmp.ne.s32.totalorder %s5897_s5, %s5254_s21  ;;  %s377_s22 = int_to_ptr.vmem [resolvable:$true] %s376_s22 }
  0x3c   : > { %p5261_p13 = scmp.lt.u32.totalorder %s5254_s21, %s5897_s5 }
  0x3d   : > { %p5257_p9 = pnand %p5255_p3, %p5628_p2 }
  0x3f   : > { %p5258_p10 = pneg %p5257_p9 }
  0x41   : > { %p5263_p1 = pnand %p5261_p13, %p5258_p10 }
  0x43   : > { %5266 = shalt.err (!%p5263_p1)
}
  0x44   : > { %s5267_s25 = scalar_lea.vmem %s377_s22, 8192  ;;  %p5275_p7 = scmp.lt.s32.totalorder %s377_s22, %s377_s22 }
  0x45   : > { %p5268_p4 = scmp.ne.s32.totalorder %s377_s22, %s5267_s25  ;;  %p5276_p8 = scmp.lt.s32.totalorder %s5267_s25, %s5267_s25 }
  0x47   : > { %p5270_p5 = pnand %p5268_p4, %p5628_p2  ;;  %p5277_p11 = por %p5276_p8, %p5275_p7 }
  0x49   : > { %p5271_p6 = pneg %p5270_p5 }
  0x4b   : > { %p5278_p12 = pnand %p5277_p11, %p5271_p6 }
  0x4d   : > { %5281 = shalt.err (!%p5278_p12)
}
  0x4e   : > { %s5450_s12 = smov 512   ;;  %s5451_s13 = smov 32  }
  0x4f   : > { %4620 = dma.hbm_to_vmem [thread:$0]  (!%p5616_p0), %s5897_s5, 8192, %s377_s22, [#allocation4], %s5450_s12, %s5450_s12, %s5451_s13  }
  0x50   : > { %s5452_s27 = smov [#allocation8]   ;;  %s5282_s18 = scalar_lea.hbm %s5901_s9, 8192 }
  0x51   : > { %s408_s21 = sshll.u32 %s5452_s27, 4  ;;  %p5283_p3 = scmp.ne.s32.totalorder %s5901_s9, %s5282_s18  ;;  %s409_s21 = int_to_ptr.vmem [resolvable:$true] %s408_s21 }
  0x52   : > { %p5289_p13 = scmp.lt.u32.totalorder %s5282_s18, %s5901_s9 }
  0x53   : > { %p5285_p9 = pnand %p5283_p3, %p5628_p2 }
  0x55   : > { %p5286_p10 = pneg %p5285_p9 }
  0x57   : > { %p5291_p1 = pnand %p5289_p13, %p5286_p10 }
  0x59   : > { %5294 = shalt.err (!%p5291_p1)
}
  0x5a   : > { %s5295_s22 = scalar_lea.vmem %s409_s21, 8192  ;;  %p5303_p7 = scmp.lt.s32.totalorder %s409_s21, %s409_s21 }
  0x5b   : > { %p5296_p4 = scmp.ne.s32.totalorder %s409_s21, %s5295_s22  ;;  %p5304_p8 = scmp.lt.s32.totalorder %s5295_s22, %s5295_s22 }
  0x5d   : > { %p5298_p5 = pnand %p5296_p4, %p5628_p2  ;;  %p5305_p11 = por %p5304_p8, %p5303_p7 }
  0x5f   : > { %p5299_p6 = pneg %p5298_p5 }
  0x61   : > { %p5306_p12 = pnand %p5305_p11, %p5299_p6 }
  0x63   : > { %5309 = shalt.err (!%p5306_p12)
}
  0x64   : > { %s5453_s12 = smov 128   ;;  %s5454_s13 = smov 8  }
  0x65   : > { %4626 = dma.hbm_to_vmem [thread:$0]  (!%p5616_p0), %s5901_s9, 8192, %s409_s21, [#allocation7], %s5453_s12, %s5453_s12, %s5454_s13  }
  0x66   : > { %s5455_s27 = smov [#allocation9]   ;;  %s5310_s14 = scalar_lea.hbm %s5903_s11, 2048 }
  0x67   : > { %s424_s15 = sshll.u32 %s5455_s27, 4  ;;  %p5311_p3 = scmp.ne.s32.totalorder %s5903_s11, %s5310_s14  ;;  %s425_s15 = int_to_ptr.vmem [resolvable:$true] %s424_s15 }
  0x68   : > { %p5317_p13 = scmp.lt.u32.totalorder %s5310_s14, %s5903_s11 }
  0x69   : > { %p5313_p9 = pnand %p5311_p3, %p5628_p2 }
  0x6b   : > { %p5314_p10 = pneg %p5313_p9 }
  0x6d   : > { %p5319_p1 = pnand %p5317_p13, %p5314_p10 }
  0x6f   : > { %5322 = shalt.err (!%p5319_p1)
}
  0x70   : > { %s5323_s21 = scalar_lea.vmem %s425_s15, 2048  ;;  %p5331_p7 = scmp.lt.s32.totalorder %s425_s15, %s425_s15 }
  0x71   : > { %p5324_p4 = scmp.ne.s32.totalorder %s425_s15, %s5323_s21  ;;  %p5332_p8 = scmp.lt.s32.totalorder %s5323_s21, %s5323_s21 }
  0x73   : > { %p5326_p5 = pnand %p5324_p4, %p5628_p2  ;;  %p5333_p11 = por %p5332_p8, %p5331_p7 }
  0x75   : > { %p5327_p6 = pneg %p5326_p5 }
  0x77   : > { %p5334_p12 = pnand %p5333_p11, %p5327_p6 }
  0x79   : > { %5337 = shalt.err (!%p5334_p12)
}
  0x7a   : > { %s5456_s12 = smov 64   ;;  %s5457_s13 = smov 4  }
  0x7b   : > { %4629 = dma.hbm_to_vmem [thread:$0]  (!%p5616_p0), %s5903_s11, 2048, %s425_s15, [#allocation10], %s5456_s12, %s5456_s12, %s5457_s13  }
  0x7c   : > { %p5941_p3 = scmp.ne.s32.totalorder %s5936_s23, 0 }
  0x7d   : > { %p5942_p9 = scmp.ne.s32.totalorder (!%p5941_p3), %s5937_s17, 0 }
  0x7e   : > { %456 = sbr.rel (%p5941_p3) target bundleno = 1861 (0x745), region = 72 }
  0x85   : > { %5399 = dma.done.wait (%p5942_p9), [#allocation4], 8192  }
  0x86   : > { %5401 = vsyncadd (%p5942_p9), [#allocation4], 4294959104 }
  0x87   : > { %5403 = dma.done.wait (%p5942_p9), [#allocation7], 40960  }
  0x88   : > { %5405 = vsyncadd (%p5942_p9), [#allocation7], 4294926336 }
  0x89   : > { %5407 = dma.done.wait (%p5942_p9), [#allocation10], 2048  }
  0x8a   : > { %5409 = vsyncadd (%p5942_p9), [#allocation10], 4294965248  ;;  %s513_s30 = sand.u32 1, %s5420_s26   ;;  %s4103_s23 = sshll.u32 %s5428_s28, 1 }
  0x8b   : > { %p516_p0 = scmp.lt.s32.totalorder %s5432_s29, 1  ;;  %p518_p2 = scmp.lt.s32.totalorder %s4103_s23, 5 }
  0x8c   : > { %s5721_s17 = scalar_lea.vmem [#allocation11], %s513_s30  ;;  %p4105_p10 = scmp.ne.s32.totalorder %s5428_s28, 0 }
  0x8d   : > { %s517_s20 = scalar_select %p516_p0, %s5432_s29, 1 }
  0x8e   : > { %s5968_s23 = smov (!%p518_p2, %s4103_s23), 5  ;;  %529 = sbr.rel (%p4105_p10) target bundleno = 149 (0x95), region = 92 }
  0x8f   : > { %s4598_s27 = smul.u32 6, %s517_s20  ;;  %v5458_v0 = vmov (!%p4105_p10), -inf  }
  0x90   : > { %530 = vst [vmem:[#allocation2] sm:$0xff] (!%p4105_p10), %v5458_v0 }
  0x91   : > { %s521_s15 = sadd.s32 %s4598_s27, %s5968_s23 }
  0x92   : > { %s4104_s24 = sshll.u32 %s521_s15, 2 }
  0x93   : > { %s523_s16 = scalar_lea.vmem %s5892_s0, %s4104_s24 }
  0x95 PF: > { %v533_v1 = vld [vmem:[%s5893_s1] sm:$0x3]  ;;  %vm550_vm0 = vcmask 1040384   ;;  %vm551_vm1 = vcmask 1041408   ;;  %v5459_v2 = vmov 0.0   ;;  %v5460_v3 = vmov 65535  }
  0x96   : > { %4548 = vmatprep.subr.bf16.mxu0 %v5459_v2  ;;  %v552_v4 = vsel %vm550_vm0, 4294967295, %v5460_v3  ;;  %4554 = vmatprep.subr.bf16.mxu1 %v5459_v2  ;;  %vm5461_vm2 = vmmov 0   ;;  %v4726_v6 = vld [vmem:[%s5895_s3] sm:$0xff]   ;;  %vm546_vm3 = vcmask 23552   ;;  %v4727_v9 = vld [vmem:[%s5895_s3 + $0x8] sm:$0xff]   ;;  %v4728_v10 = vld [vmem:[%s5895_s3 + $0x10] sm:$0xff]  }
  0x97   : > { %v553_v5 = vsel %vm551_vm1, %v552_v4, 0  ;;  %4550 = vmatprep.mubr.msk.bf16.mxu0 %vm5461_vm2, %v5459_v2  ;;  %4562 = vmatprep.mubr.msk.bf16.mxu1 %vm5461_vm2, %v5459_v2  ;;  %v4725_v8 = vld [vmem:[%s523_s16] sm:$0xff]   ;;  %v4729_v11 = vld [vmem:[%s5895_s3 + $0x18] sm:$0xff]   ;;  %v688_v12 = vld [vmem:[#allocation3] sm:$0xff]  ;;  %vm640_vm4 = vcmask 523264   ;;  %p4179_p13 = scmp.ne.s32.totalorder %s5428_s28, 2 }
  0x98   : > { %v555_v7 = vand.u32 %v553_v5, %v533_v1  ;;  %4555 = vmatpush3.bf16.msra.mxu1 %v4726_v6  ;;  %v692_v13 = vld [vmem:[#allocation3 + $0x20] sm:$0xff]  ;;  %v689_v14 = vld [vmem:[#allocation3 + $0x8] sm:$0xff]  ;;  %v4106_v40 = vld [vmem:[%s5894_s2] ss:$0 sm:$0xff]  ;;  %s5943_s25 = sld [smem:[#allocation26_spill]] (!%p4179_p13)  ;;  %s5944_s12 = sld [smem:[#allocation27_spill]] (!%p4179_p13) }
  0x99   : > { %4556 = vmatprep.subr.bf16.mxu1 %v5459_v2  ;;  %v4115_v15 = vcombine.low %v688_v12, %v692_v13  ;;  %v4116_v16 = vcombine.high %v688_v12, %v692_v13  ;;  %v693_v17 = vld [vmem:[#allocation3 + $0x28] sm:$0xff]  ;;  %v696_v18 = vld [vmem:[#allocation3 + $0x40] sm:$0xff]  ;;  %s5945_s10 = sld [smem:[#allocation28_spill]] (!%p4179_p13) }
  0x9a   : > { %4549 = vmatpush3.bf16.msra.mxu0 %v555_v7  ;;  %v700_v19 = vld [vmem:[#allocation3 + $0x60] sm:$0xff]  ;;  %v4117_v20 = vcombine.low %v689_v14, %v693_v17  ;;  %v4118_v21 = vcombine.high %v689_v14, %v693_v17  ;;  %v697_v47 = vld [vmem:[#allocation3 + $0x48] sm:$0xff] }
  0x9b   : > { %v4124_v22 = vcombine.high %v696_v18, %v700_v19  ;;  %1072 = vmatprep.subr.bf16.mxu0 %v4116_v16  ;;  %v4123_v23 = vcombine.low %v696_v18, %v700_v19  ;;  %v704_v24 = vld [vmem:[#allocation3 + $0x80] sm:$0xff]  ;;  %v701_v48 = vld [vmem:[#allocation3 + $0x68] sm:$0xff] }
  0x9c   : > { %4557 = vmatpush3.bf16.msra.mxu1 %v4727_v9  ;;  %v708_v25 = vld [vmem:[#allocation3 + $0xa0] sm:$0xff]  ;;  %v4126_v52 = vcombine.high %v697_v47, %v701_v48  ;;  %v705_v53 = vld [vmem:[#allocation3 + $0x88] sm:$0xff]  ;;  %v4125_v55 = vcombine.low %v697_v47, %v701_v48  ;;  %v706_v47 = vld [vmem:[#allocation3 + $0x90] sm:$0xff] }
  0x9d   : > { %4551 = vmatmul.mubr.msk.bf16.vlgmr.msra.gmra.mrb[0].mxu0 %vm546_vm3, %v4725_v8  ;;  %4558 = vmatprep.subr.bf16.mxu1 %v5459_v2  ;;  %v4132_v26 = vcombine.high %v704_v24, %v708_v25  ;;  %v4131_v27 = vcombine.low %v704_v24, %v708_v25  ;;  %v712_v28 = vld [vmem:[#allocation3 + $0xc0] sm:$0xff]  ;;  %v709_v54 = vld [vmem:[#allocation3 + $0xa8] sm:$0xff]  ;;  %v691_v24 = vld [vmem:[#allocation3 + $0x18] sm:$0xff] }
  0x9e   : > { %1073 = vmatpush1.bf16.msra.mxu0 %v4115_v15  ;;  %v716_v29 = vld [vmem:[#allocation3 + $0xe0] sm:$0xff]  ;;  %v4134_v56 = vcombine.high %v705_v53, %v709_v54  ;;  %v713_v57 = vld [vmem:[#allocation3 + $0xc8] sm:$0xff]  ;;  %v4133_v59 = vcombine.low %v705_v53, %v709_v54  ;;  %v710_v48 = vld [vmem:[#allocation3 + $0xb0] sm:$0xff] }
  0x9f   : > { %1074 = vmatprep.subr.bf16.mxu0 %v4124_v22  ;;  %v4140_v30 = vcombine.high %v712_v28, %v716_v29  ;;  %v4139_v31 = vcombine.low %v712_v28, %v716_v29  ;;  %v720_v32 = vld [vmem:[#allocation3 + $0x100] sm:$0xff]  ;;  %v717_v58 = vld [vmem:[#allocation3 + $0xe8] sm:$0xff]  ;;  %v690_v22 = vld [vmem:[#allocation3 + $0x10] sm:$0xff]  ;;  %v4136_v53 = vcombine.high %v706_v47, %v710_v48 }
  0xa0   : > { %4559 = vmatpush3.bf16.msra.mxu1 %v4728_v10  ;;  %v724_v33 = vld [vmem:[#allocation3 + $0x120] sm:$0xff]  ;;  %v4142_v60 = vcombine.high %v713_v57, %v717_v58  ;;  %v721_v61 = vld [vmem:[#allocation3 + $0x108] sm:$0xff]  ;;  %v4141_v63 = vcombine.low %v713_v57, %v717_v58  ;;  %v715_v57 = vld [vmem:[#allocation3 + $0xd8] sm:$0xff] }
  0xa1   : > { %4560 = vmatprep.subr.bf16.mxu1 %v5459_v2  ;;  %v4148_v34 = vcombine.high %v720_v32, %v724_v33  ;;  %v4147_v35 = vcombine.low %v720_v32, %v724_v33  ;;  %v728_v36 = vld [vmem:[#allocation3 + $0x140] sm:$0xff]  ;;  %v725_v62 = vld [vmem:[#allocation3 + $0x128] sm:$0xff]  ;;  %v719_v58 = vld [vmem:[#allocation3 + $0xf8] sm:$0xff] }
  0xa2   : > { %1075 = vmatpush1.bf16.msra.mxu0 %v4123_v23  ;;  %v732_v37 = vld [vmem:[#allocation3 + $0x160] sm:$0xff]  ;;  %v4150_v0 = vcombine.high %v721_v61, %v725_v62  ;;  %v729_v1 = vld [vmem:[#allocation3 + $0x148] sm:$0xff]  ;;  %v4149_v3 = vcombine.low %v721_v61, %v725_v62  ;;  %v694_v23 = vld [vmem:[#allocation3 + $0x30] sm:$0xff]  ;;  %v4146_v62 = vcombine.high %v715_v57, %v719_v58 }
  0xa3   : > { %1076 = vmatprep.subr.bf16.mxu0 %v4132_v26  ;;  %v4156_v38 = vcombine.high %v728_v36, %v732_v37  ;;  %v4155_v39 = vcombine.low %v728_v36, %v732_v37  ;;  %v733_v2 = vld [vmem:[#allocation3 + $0x168] sm:$0xff]  ;;  %v736_v6 = vld [vmem:[#allocation3 + $0x180] sm:$0xff]  ;;  %v4120_v25 = vcombine.high %v690_v22, %v694_v23  ;;  %v695_v26 = vld [vmem:[#allocation3 + $0x38] sm:$0xff] }
  0xa4   : > { %4561 = vmatpush3.bf16.msra.mxu1 %v4729_v11  ;;  %v4158_v4 = vcombine.high %v729_v1, %v733_v2  ;;  %v4157_v5 = vcombine.low %v729_v1, %v733_v2  ;;  %v740_v7 = vld [vmem:[#allocation3 + $0x1a0] sm:$0xff]  ;;  %v737_v8 = vld [vmem:[#allocation3 + $0x188] sm:$0xff]  ;;  %v4121_v28 = vcombine.low %v691_v24, %v695_v26  ;;  %v4122_v29 = vcombine.high %v691_v24, %v695_v26  ;;  %v723_v1 = vld [vmem:[#allocation3 + $0x118] sm:$0xff] }
  0xa5   : > { %1115 = vmatprep.subr.bf16.mxu1 %v4118_v21  ;;  %v4164_v9 = vcombine.high %v736_v6, %v740_v7  ;;  %v741_v10 = vld [vmem:[#allocation3 + $0x1a8] sm:$0xff]  ;;  %v4163_v11 = vcombine.low %v736_v6, %v740_v7  ;;  %v744_v14 = vld [vmem:[#allocation3 + $0x1c0] sm:$0xff]  ;;  %v727_v2 = vld [vmem:[#allocation3 + $0x138] sm:$0xff] }
  0xa6   : > { %1077 = vmatpush1.bf16.msra.mxu0 %v4131_v27  ;;  %v4165_v12 = vcombine.low %v737_v8, %v741_v10  ;;  %v4166_v13 = vcombine.high %v737_v8, %v741_v10  ;;  %v748_v15 = vld [vmem:[#allocation3 + $0x1e0] sm:$0xff]  ;;  %v745_v16 = vld [vmem:[#allocation3 + $0x1c8] sm:$0xff]  ;;  %v4119_v27 = vcombine.low %v690_v22, %v694_v23  ;;  %v4154_v6 = vcombine.high %v723_v1, %v727_v2  ;;  %v730_v7 = vld [vmem:[#allocation3 + $0x150] sm:$0xff] }
  0xa7   : > { %1078 = vmatprep.subr.bf16.mxu0 %v4140_v30  ;;  %v4172_v17 = vcombine.high %v744_v14, %v748_v15  ;;  %v749_v18 = vld [vmem:[#allocation3 + $0x1e8] sm:$0xff]  ;;  %v4171_v19 = vcombine.low %v744_v14, %v748_v15  ;;  %v5462_v30 = vmov 0   ;;  %v734_v8 = vld [vmem:[#allocation3 + $0x170] sm:$0xff]  ;;  %v735_v10 = vld [vmem:[#allocation3 + $0x178] sm:$0xff] }
  0xa8   : > { %v4174_v21 = vcombine.high %v745_v16, %v749_v18  ;;  %1104 = vmatprep.mubr.bf16.mxu0 %v5462_v30  ;;  %v738_v15 = vld [vmem:[#allocation3 + $0x190] sm:$0xff]  ;;  %v751_v26 = vld [vmem:[#allocation3 + $0x1f8] sm:$0xff] }
  0xa9   : > { %v746_v23 = vld [vmem:[#allocation3 + $0x1d0] sm:$0xff] }
  0xaa   : > { %1079 = vmatpush1.bf16.msra.mxu0 %v4139_v31  ;;  %v4109_v31 = vld [vmem:[%s5896_s4] ss:$0 sm:$0xff]  ;;  %v750_v24 = vld [vmem:[#allocation3 + $0x1f0] sm:$0xff] }
  0xab   : > { %1080 = vmatprep.subr.bf16.mxu0 %v4148_v34 }
  0xae   : > { %1081 = vmatpush1.bf16.msra.mxu0 %v4147_v35 }
  0xaf   : > { %1082 = vmatprep.subr.bf16.mxu0 %v4156_v38  ;;  %v698_v38 = vld [vmem:[#allocation3 + $0x50] sm:$0xff] }
  0xb2   : > { %1083 = vmatpush1.bf16.msra.mxu0 %v4155_v39  ;;  %v702_v39 = vld [vmem:[#allocation3 + $0x70] sm:$0xff] }
  0xb3   : > { %1084 = vmatprep.subr.bf16.mxu0 %v4164_v9  ;;  %v731_v9 = vld [vmem:[#allocation3 + $0x158] sm:$0xff] }
  0xb4   : > { %v4162_v14 = vcombine.high %v731_v9, %v735_v10 }
  0xb6   : > { %1085 = vmatpush1.bf16.msra.mxu0 %v4163_v11 }
  0xb7   : > { %1086 = vmatprep.subr.bf16.mxu0 %v4172_v17  ;;  %v739_v17 = vld [vmem:[#allocation3 + $0x198] sm:$0xff] }
  0xba   : > { %1087 = vmatpush1.bf16.msra.mxu0 %v4171_v19  ;;  %v4159_v19 = vcombine.low %v730_v7, %v734_v8 }
  0xbb   : > { %1158 = vmatprep.subr.bf16.mxu0 %v4120_v25  ;;  %v747_v25 = vld [vmem:[#allocation3 + $0x1d8] sm:$0xff] }
 0x170   : > { %v591_v41 = vpop.f32.mrb[0].mxu0 }
 0x171   : > { %v592_v42 = vadd.f32 %v4106_v40, %v591_v41  ;;  %v4552_v43 = vpop.f32.mrb[1].mxu0  ;;  %v703_v41 = vld [vmem:[#allocation3 + $0x78] sm:$0xff] }
 0x172   : > { %v594_v44 = vpop.f32.mrb[2].mxu0 }
 0x173   : > { %v595_v45 = vadd.f32 %v4106_v40, %v594_v44  ;;  %v4553_v46 = vpop.f32.mrb[3].mxu0  ;;  %v598_v49 = vmax.f32 %v592_v42, 0.0  ;;  %v699_v40 = vld [vmem:[#allocation3 + $0x58] sm:$0xff] }
 0x174   : > { %v4130_v46 = vcombine.high %v699_v40, %v703_v41 }
 0x175   : > { %v599_v50 = vmax.f32 %v595_v45, 0.0  ;;  %v4128_v45 = vcombine.high %v698_v38, %v702_v39 }
 0x177   : > { %v600_v51 = vpack.c.bf16 %v599_v50, %v598_v49  ;;  %v707_v49 = vld [vmem:[#allocation3 + $0x98] sm:$0xff] }
 0x178   : > { %v711_v50 = vld [vmem:[#allocation3 + $0xb8] sm:$0xff] }
 0x179   : > { %4563 = vmatmul.mubr.msk.bf16.vlgmr.msra.gmra.mrb[0].mxu1 %vm640_vm4, %v600_v51  ;;  %v4127_v51 = vcombine.low %v698_v38, %v702_v39  ;;  %v4138_v54 = vcombine.high %v707_v49, %v711_v50 }
 0x17a   : > { %1116 = vmatpush1.bf16.msra.mxu1 %v4117_v20  ;;  %v4173_v20 = vcombine.low %v745_v16, %v749_v18  ;;  %1147 = vmatprep.mubr.bf16.mxu1 %v5462_v30  ;;  %v742_v16 = vld [vmem:[#allocation3 + $0x1b0] sm:$0xff]  ;;  %v743_v18 = vld [vmem:[#allocation3 + $0x1b8] sm:$0xff] }
 0x17b   : > { %1117 = vmatprep.subr.bf16.mxu1 %v4126_v52  ;;  %v4129_v52 = vcombine.low %v699_v40, %v703_v41  ;;  %v4170_v22 = vcombine.high %v739_v17, %v743_v18 }
 0x17e   : > { %1118 = vmatpush1.bf16.msra.mxu1 %v4125_v55  ;;  %v714_v55 = vld [vmem:[#allocation3 + $0xd0] sm:$0xff] }
 0x17f   : > { %1119 = vmatprep.subr.bf16.mxu1 %v4134_v56  ;;  %v718_v56 = vld [vmem:[#allocation3 + $0xf0] sm:$0xff] }
 0x180   : > { %v4144_v61 = vcombine.high %v714_v55, %v718_v56 }
 0x182   : > { %1120 = vmatpush1.bf16.msra.mxu1 %v4133_v59  ;;  %v4135_v59 = vcombine.low %v706_v47, %v710_v48 }
 0x183   : > { %1121 = vmatprep.subr.bf16.mxu1 %v4142_v60  ;;  %v4137_v60 = vcombine.low %v707_v49, %v711_v50 }
 0x186   : > { %1122 = vmatpush1.bf16.msra.mxu1 %v4141_v63  ;;  %v722_v63 = vld [vmem:[#allocation3 + $0x110] sm:$0xff] }
 0x187   : > { %1123 = vmatprep.subr.bf16.mxu1 %v4150_v0  ;;  %v726_v0 = vld [vmem:[#allocation3 + $0x130] sm:$0xff] }
 0x188   : > { %v4151_v11 = vcombine.low %v722_v63, %v726_v0 }
 0x18a   : > { %1124 = vmatpush1.bf16.msra.mxu1 %v4149_v3  ;;  %v4143_v3 = vcombine.low %v714_v55, %v718_v56 }
 0x18b   : > { %1125 = vmatprep.subr.bf16.mxu1 %v4158_v4  ;;  %v4145_v4 = vcombine.low %v715_v57, %v719_v58 }
 0x18e   : > { %1126 = vmatpush1.bf16.msra.mxu1 %v4157_v5  ;;  %v4152_v5 = vcombine.high %v722_v63, %v726_v0 }
 0x18f   : > { %1127 = vmatprep.subr.bf16.mxu1 %v4166_v13  ;;  %v4160_v13 = vcombine.high %v730_v7, %v734_v8 }
 0x192   : > { %1128 = vmatpush1.bf16.msra.mxu1 %v4165_v12  ;;  %v4153_v12 = vcombine.low %v723_v1, %v727_v2 }
 0x193   : > { %1129 = vmatprep.subr.bf16.mxu1 %v4174_v21  ;;  %v4168_v21 = vcombine.high %v738_v15, %v742_v16 }
 0x196   : > { %1130 = vmatpush1.bf16.msra.mxu1 %v4173_v20  ;;  %v4161_v20 = vcombine.low %v731_v9, %v735_v10 }
 0x197   : > { %1201 = vmatprep.subr.bf16.mxu1 %v4122_v29  ;;  %v4176_v29 = vcombine.high %v746_v23, %v750_v24 }
 0x24c   : > { %v678_v32 = vpop.f32.mrb[0].mxu1 }
 0x24d   : > { %v679_v33 = vadd.f32 %v4109_v31, %v678_v32  ;;  %v4564_v34 = vpop.f32.mrb[1].mxu1  ;;  %v4177_v32 = vcombine.low %v747_v25, %v751_v26 }
 0x24e   : > { %v681_v35 = vpop.f32.mrb[2].mxu1 }
 0x24f   : > { %v682_v36 = vadd.f32 %v4109_v31, %v681_v35  ;;  %v4565_v37 = vpop.f32.mrb[3].mxu1  ;;  %v685_v42 = vmax.f32 %v679_v33, 0.0  ;;  %v4175_v31 = vcombine.low %v746_v23, %v750_v24 }
 0x251   : > { %v686_v43 = vmax.f32 %v682_v36, 0.0 }
 0x253   : > { %v5745_v44 = vpack.c.bf16 %v686_v43, %v685_v42 }
 0x255   : > { %1105 = vmatmul.mubr.bf16.vlgmr.msra.gmra.mrb[4].mxu0 %v5745_v44  ;;  %1148 = vmatmul.mubr.bf16.vlgmr.msra.gmra.mrb[4].mxu1 %v5745_v44 }
 0x256   : > { %1159 = vmatpush1.bf16.msra.mxu0 %v4119_v27  ;;  %1202 = vmatpush1.bf16.msra.mxu1 %v4121_v28  ;;  %v4167_v27 = vcombine.low %v738_v15, %v742_v16  ;;  %v4169_v28 = vcombine.low %v739_v17, %v743_v18 }
 0x257   : > { %1160 = vmatprep.subr.bf16.mxu0 %v4128_v45  ;;  %1203 = vmatprep.subr.bf16.mxu1 %v4130_v46 }
 0x258   : > { %1190 = vmatprep.mubr.bf16.mxu0 %v5462_v30  ;;  %1233 = vmatprep.mubr.bf16.mxu1 %v5462_v30  ;;  %v4178_v30 = vcombine.high %v747_v25, %v751_v26 }
 0x25a   : > { %1161 = vmatpush1.bf16.msra.mxu0 %v4127_v51  ;;  %1204 = vmatpush1.bf16.msra.mxu1 %v4129_v52 }
 0x25b   : > { %1162 = vmatprep.subr.bf16.mxu0 %v4136_v53  ;;  %1205 = vmatprep.subr.bf16.mxu1 %v4138_v54  ;;  %v1316_v54 = vlaneseq }
 0x25d   : > { %v5751_v0 = vshrl.u32 %v1316_v54, 7 }
 0x25e   : > { %1163 = vmatpush1.bf16.msra.mxu0 %v4135_v59  ;;  %1206 = vmatpush1.bf16.msra.mxu1 %v4137_v60 }
 0x25f   : > { %1164 = vmatprep.subr.bf16.mxu0 %v4144_v61  ;;  %1207 = vmatprep.subr.bf16.mxu1 %v4146_v62 }
 0x262   : > { %1165 = vmatpush1.bf16.msra.mxu0 %v4143_v3  ;;  %1208 = vmatpush1.bf16.msra.mxu1 %v4145_v4 }
 0x263   : > { %1166 = vmatprep.subr.bf16.mxu0 %v4152_v5  ;;  %1209 = vmatprep.subr.bf16.mxu1 %v4154_v6 }
 0x266   : > { %1167 = vmatpush1.bf16.msra.mxu0 %v4151_v11  ;;  %1210 = vmatpush1.bf16.msra.mxu1 %v4153_v12 }
 0x267   : > { %1168 = vmatprep.subr.bf16.mxu0 %v4160_v13  ;;  %1211 = vmatprep.subr.bf16.mxu1 %v4162_v14 }
 0x26a   : > { %1169 = vmatpush1.bf16.msra.mxu0 %v4159_v19  ;;  %1212 = vmatpush1.bf16.msra.mxu1 %v4161_v20 }
 0x26b   : > { %1170 = vmatprep.subr.bf16.mxu0 %v4168_v21  ;;  %1213 = vmatprep.subr.bf16.mxu1 %v4170_v22 }
 0x26e   : > { %1171 = vmatpush1.bf16.msra.mxu0 %v4167_v27  ;;  %1214 = vmatpush1.bf16.msra.mxu1 %v4169_v28 }
 0x26f   : > { %1172 = vmatprep.subr.bf16.mxu0 %v4176_v29  ;;  %1215 = vmatprep.subr.bf16.mxu1 %v4178_v30 }
 0x272   : > { %1173 = vmatpush1.bf16.msra.mxu0 %v4175_v31  ;;  %1216 = vmatpush1.bf16.msra.mxu1 %v4177_v32 }
 0x275   : > { %1191 = vmatmul.mubr.bf16.vlgmr.msra.gmra.mrb[8].mxu0 %v5745_v44  ;;  %1234 = vmatmul.mubr.bf16.vlgmr.msra.gmra.mrb[8].mxu1 %v5745_v44  ;;  %v5463_v44 = vmov 1966171168  }
 0x276   : > { %v1314_v53 = vunpack.c.l.s4 %v5463_v44 }
 0x278   : > { %v1315_v63 = vunpack.c.0.s8 %v1314_v53 }
 0x27a   : > { %v1318_v9 = vsub.s32 %v1315_v63, %v5751_v0  ;;  %v4732_v63 = vld [vmem:[#allocation6 + $0x204] ss:$16 sps:$4 sm:$0xff] (!%p4179_p13)  }
 0x27b   : > { %3017 = vmatprep.subr.bf16.mxu0 (!%p4179_p13), %v4732_v63  ;;  %v4812_v63 = vld [vmem:[#allocation6 + $0x1a0] ss:$16 sps:$4 sm:$0xff] (!%p4179_p13)  }
 0x328   : > { %v1106_v33 = vpop.f32.mrb[4].mxu0  ;;  %v1149_v34 = vpop.f32.mrb[4].mxu1 }
 0x329   : > { %v1108_v35 = vpop.f32.mrb[5].mxu0  ;;  %v1151_v36 = vpop.f32.mrb[5].mxu1 }
 0x32a   : > { %v1110_v37 = vpop.f32.mrb[6].mxu0  ;;  %v1153_v38 = vpop.f32.mrb[6].mxu1 }
 0x32b   : > { %v1245_v39 = vmax.f32 %v1106_v33, %v1110_v37  ;;  %v1259_v40 = vmax.f32 %v1149_v34, %v1153_v38  ;;  %v1112_v41 = vpop.f32.mrb[7].mxu0  ;;  %v1155_v42 = vpop.f32.mrb[7].mxu1 }
 0x32c   : > { %v1252_v43 = vmax.f32 %v1108_v35, %v1112_v41  ;;  %v1266_v45 = vmax.f32 %v1151_v36, %v1155_v42 }
 0x32d   : > { %v1246_v46 = vrot.slane %v1245_v39, 4  ;;  %v1260_v47 = vrot.slane %v1259_v40, 4 }
 0x32e   : > { %v1253_v48 = vrot.slane %v1252_v43, 4  ;;  %v1267_v49 = vrot.slane %v1266_v45, 4 }
 0x32f   : > { %v1247_v50 = vmax.f32 %v1245_v39, %v1246_v46  ;;  %v1261_v51 = vmax.f32 %v1259_v40, %v1260_v47 }
 0x330   : > { %v1254_v52 = vmax.f32 %v1252_v43, %v1253_v48  ;;  %v1268_v55 = vmax.f32 %v1266_v45, %v1267_v49 }
 0x331   : > { %v1248_v56 = vrot.slane %v1247_v50, 2  ;;  %v1262_v57 = vrot.slane %v1261_v51, 2 }
 0x332   : > { %v1255_v58 = vrot.slane %v1254_v52, 2  ;;  %v1269_v59 = vrot.slane %v1268_v55, 2 }
 0x333   : > { %v1249_v60 = vmax.f32 %v1247_v50, %v1248_v56  ;;  %v1263_v61 = vmax.f32 %v1261_v51, %v1262_v57 }
 0x334   : > { %v1256_v62 = vmax.f32 %v1254_v52, %v1255_v58  ;;  %v1270_v1 = vmax.f32 %v1268_v55, %v1269_v59  ;;  %v1244_v59 = vld [vmem:[#allocation2] sm:$0xff] }
 0x335   : > { %v1250_v2 = vrot.slane %v1249_v60, 1  ;;  %v1264_v3 = vrot.slane %v1263_v61, 1 }
 0x336   : > { %v1257_v4 = vrot.slane %v1256_v62, 1  ;;  %v1271_v5 = vrot.slane %v1270_v1, 1 }
 0x337   : > { %v1251_v6 = vmax.f32 %v1249_v60, %v1250_v2  ;;  %v1265_v7 = vmax.f32 %v1263_v61, %v1264_v3  ;;  %v4735_v2 = vld [vmem:[#allocation6 + $0x200] ss:$16 sps:$4 sm:$0xff] (!%p4179_p13)   ;;  %v4736_v3 = vld [vmem:[#allocation6 + $0x24] ss:$16 sps:$4 sm:$0xff] (!%p4179_p13)  }
 0x338   : > { %v1258_v8 = vmax.f32 %v1256_v62, %v1257_v4  ;;  %v1272_v10 = vmax.f32 %v1270_v1, %v1271_v5  ;;  %v4730_v62 = vld [vmem:[#allocation6 + $0x4] ss:$16 sps:$4 sm:$0xff] (!%p4179_p13)   ;;  %v4734_v1 = vld [vmem:[#allocation6] ss:$16 sps:$4 sm:$0xff] (!%p4179_p13)   ;;  %3018 = vmatpush1.bf16.msra.mxu0 (!%p4179_p13), %v4735_v2 }
 0x339   : > { %2976 = vmatprep.subr.bf16.mxu1 (!%p4179_p13), %v4730_v62  ;;  %v4738_v4 = vld [vmem:[#allocation6 + $0x224] ss:$16 sps:$4 sm:$0xff] (!%p4179_p13)   ;;  %v4740_v5 = vld [vmem:[#allocation6 + $0x20] ss:$16 sps:$4 sm:$0xff] (!%p4179_p13)  }
 0x33a   : > { %v1309_v11 = vcombine.low %v1251_v6, %v1258_v8  ;;  %v1310_v12 = vcombine.low %v1265_v7, %v1272_v10  ;;  %2977 = vmatpush1.bf16.msra.mxu1 (!%p4179_p13), %v4734_v1  ;;  %v4741_v6 = vld [vmem:[#allocation6 + $0x220] ss:$16 sps:$4 sm:$0xff] (!%p4179_p13)   ;;  %3019 = vmatprep.subr.bf16.mxu0 (!%p4179_p13), %v4738_v4  ;;  %v4742_v7 = vld [vmem:[#allocation6 + $0x44] ss:$16 sps:$4 sm:$0xff] (!%p4179_p13)   ;;  %v5773_v4 = vsub.s32 (!%p4179_p13), 0, %v5751_v0 }
 0x33b   : > { %2978 = vmatprep.subr.bf16.mxu1 (!%p4179_p13), %v4736_v3  ;;  %v4744_v8 = vld [vmem:[#allocation6 + $0x244] ss:$16 sps:$4 sm:$0xff] (!%p4179_p13)   ;;  %v4747_v10 = vld [vmem:[#allocation6 + $0x240] ss:$16 sps:$4 sm:$0xff] (!%p4179_p13)  }
 0x33c   : > { %v1319_v13 = vrot.slane %v1309_v11, %v1318_v9  ;;  %v1326_v14 = vrot.slane %v1310_v12, %v1318_v9  ;;  %3020 = vmatpush1.bf16.msra.mxu0 (!%p4179_p13), %v4741_v6  ;;  %v4748_v11 = vld [vmem:[#allocation6 + $0x64] ss:$16 sps:$4 sm:$0xff] (!%p4179_p13)   ;;  %v4813_v1 = vld [vmem:[#allocation6 + $0x3a0] ss:$16 sps:$4 sm:$0xff] (!%p4179_p13)  }
 0x33d   : > { %3021 = vmatprep.subr.bf16.mxu0 (!%p4179_p13), %v4744_v8  ;;  %v4750_v12 = vld [vmem:[#allocation6 + $0x264] ss:$16 sps:$4 sm:$0xff] (!%p4179_p13)   ;;  %v4818_v6 = vld [vmem:[#allocation6 + $0x1c0] ss:$16 sps:$4 sm:$0xff] (!%p4179_p13)  }
 0x33e   : > { %v1341_v15 = vcombine.low %v1319_v13, %v1326_v14  ;;  %2979 = vmatpush1.bf16.msra.mxu1 (!%p4179_p13), %v4740_v5  ;;  %v4752_v13 = vld [vmem:[#allocation6 + $0x60] ss:$16 sps:$4 sm:$0xff] (!%p4179_p13)   ;;  %v4814_v2 = vld [vmem:[#allocation6 + $0x1c4] ss:$16 sps:$4 sm:$0xff] (!%p4179_p13)   ;;  %v1380_v5 = vsub.s32 (!%p4179_p13), 2, %v5751_v0 }
 0x33f   : > { %2980 = vmatprep.subr.bf16.mxu1 (!%p4179_p13), %v4742_v7  ;;  %v4753_v14 = vld [vmem:[#allocation6 + $0x260] ss:$16 sps:$4 sm:$0xff] (!%p4179_p13)   ;;  %v4816_v3 = vld [vmem:[#allocation6 + $0x3c4] ss:$16 sps:$4 sm:$0xff] (!%p4179_p13)  }
 0x340   : > { %v1349_v57 = vrot.slane %v1341_v15, %v1318_v9  ;;  %3022 = vmatpush1.bf16.msra.mxu0 (!%p4179_p13), %v4747_v10  ;;  %v4754_v15 = vld [vmem:[#allocation6 + $0x84] ss:$16 sps:$4 sm:$0xff] (!%p4179_p13)   ;;  %v4819_v7 = vld [vmem:[#allocation6 + $0x3c0] ss:$16 sps:$4 sm:$0xff] (!%p4179_p13)   ;;  %v1392_v10 = vsub.s32 (!%p4179_p13), 5, %v5751_v0 }
 0x341   : > { %3023 = vmatprep.subr.bf16.mxu0 (!%p4179_p13), %v4750_v12  ;;  %v4820_v8 = vld [vmem:[#allocation6 + $0x1e4] ss:$16 sps:$4 sm:$0xff] (!%p4179_p13)  }
 0x344   : > { %3024 = vmatpush1.bf16.msra.mxu0 (!%p4179_p13), %v4753_v14  ;;  %v4825_v14 = vld [vmem:[#allocation6 + $0x3e0] ss:$16 sps:$4 sm:$0xff] (!%p4179_p13)  }
 0x348   : > { %v1192_v16 = vpop.f32.mrb[8].mxu0  ;;  %v1235_v17 = vpop.f32.mrb[8].mxu1 }
 0x349   : > { %v1194_v18 = vpop.f32.mrb[9].mxu0  ;;  %v1237_v19 = vpop.f32.mrb[9].mxu1 }
 0x34a   : > { %v1196_v20 = vpop.f32.mrb[10].mxu0  ;;  %v1239_v21 = vpop.f32.mrb[10].mxu1 }
 0x34b   : > { %v1273_v22 = vmax.f32 %v1192_v16, %v1196_v20  ;;  %v1287_v23 = vmax.f32 %v1235_v17, %v1239_v21  ;;  %v1198_v24 = vpop.f32.mrb[11].mxu0  ;;  %v1241_v25 = vpop.f32.mrb[11].mxu1  ;;  %v4756_v16 = vld [vmem:[#allocation6 + $0x284] ss:$16 sps:$4 sm:$0xff] (!%p4179_p13)   ;;  %v4758_v17 = vld [vmem:[#allocation6 + $0x80] ss:$16 sps:$4 sm:$0xff] (!%p4179_p13)  }
 0x34c   : > { %v1280_v26 = vmax.f32 %v1194_v18, %v1198_v24  ;;  %v1294_v27 = vmax.f32 %v1237_v19, %v1241_v25  ;;  %v4759_v18 = vld [vmem:[#allocation6 + $0x280] ss:$16 sps:$4 sm:$0xff] (!%p4179_p13)   ;;  %v4760_v19 = vld [vmem:[#allocation6 + $0xa4] ss:$16 sps:$4 sm:$0xff] (!%p4179_p13)   ;;  %3025 = vmatprep.subr.bf16.mxu0 (!%p4179_p13), %v4756_v16  ;;  %v4831_v16 = vld [vmem:[#allocation6 + $0xc] ss:$16 sps:$4 sm:$0xff] (!%p4179_p13)  }
 0x34d   : > { %v1274_v28 = vrot.slane %v1273_v22, 4  ;;  %v1288_v29 = vrot.slane %v1287_v23, 4  ;;  %v4762_v20 = vld [vmem:[#allocation6 + $0x2a4] ss:$16 sps:$4 sm:$0xff] (!%p4179_p13)   ;;  %v4764_v21 = vld [vmem:[#allocation6 + $0xa0] ss:$16 sps:$4 sm:$0xff] (!%p4179_p13)   ;;  %3026 = vmatpush1.bf16.msra.mxu0 (!%p4179_p13), %v4759_v18 }
 0x34e   : > { %v1281_v30 = vrot.slane %v1280_v26, 4  ;;  %v1295_v31 = vrot.slane %v1294_v27, 4  ;;  %3027 = vmatprep.subr.bf16.mxu0 (!%p4179_p13), %v4762_v20  ;;  %v4768_v24 = vld [vmem:[#allocation6 + $0x2c4] ss:$16 sps:$4 sm:$0xff] (!%p4179_p13)   ;;  %v4770_v25 = vld [vmem:[#allocation6 + $0xc0] ss:$16 sps:$4 sm:$0xff] (!%p4179_p13)  }
 0x34f   : > { %v1275_v32 = vmax.f32 %v1273_v22, %v1274_v28  ;;  %v1289_v33 = vmax.f32 %v1287_v23, %v1288_v29  ;;  %v4765_v22 = vld [vmem:[#allocation6 + $0x2a0] ss:$16 sps:$4 sm:$0xff] (!%p4179_p13)   ;;  %v4766_v23 = vld [vmem:[#allocation6 + $0xc4] ss:$16 sps:$4 sm:$0xff] (!%p4179_p13)  }
 0x350   : > { %v1282_v34 = vmax.f32 %v1280_v26, %v1281_v30  ;;  %v1296_v35 = vmax.f32 %v1294_v27, %v1295_v31  ;;  %v4771_v26 = vld [vmem:[#allocation6 + $0x2c0] ss:$16 sps:$4 sm:$0xff] (!%p4179_p13)   ;;  %v4772_v27 = vld [vmem:[#allocation6 + $0xe4] ss:$16 sps:$4 sm:$0xff] (!%p4179_p13)  }
 0x351   : > { %v1276_v36 = vrot.slane %v1275_v32, 2  ;;  %v1290_v37 = vrot.slane %v1289_v33, 2  ;;  %3028 = vmatpush1.bf16.msra.mxu0 (!%p4179_p13), %v4765_v22  ;;  %v4774_v28 = vld [vmem:[#allocation6 + $0x2e4] ss:$16 sps:$4 sm:$0xff] (!%p4179_p13)   ;;  %v4776_v29 = vld [vmem:[#allocation6 + $0xe0] ss:$16 sps:$4 sm:$0xff] (!%p4179_p13)  }
 0x352   : > { %v1283_v38 = vrot.slane %v1282_v34, 2  ;;  %v1297_v39 = vrot.slane %v1296_v35, 2  ;;  %3029 = vmatprep.subr.bf16.mxu0 (!%p4179_p13), %v4768_v24  ;;  %v4777_v30 = vld [vmem:[#allocation6 + $0x2e0] ss:$16 sps:$4 sm:$0xff] (!%p4179_p13)   ;;  %v4778_v31 = vld [vmem:[#allocation6 + $0x104] ss:$16 sps:$4 sm:$0xff] (!%p4179_p13)  }
 0x353   : > { %v1277_v40 = vmax.f32 %v1275_v32, %v1276_v36  ;;  %v1291_v41 = vmax.f32 %v1289_v33, %v1290_v37  ;;  %v4780_v32 = vld [vmem:[#allocation6 + $0x304] ss:$16 sps:$4 sm:$0xff] (!%p4179_p13)   ;;  %v4782_v33 = vld [vmem:[#allocation6 + $0x100] ss:$16 sps:$4 sm:$0xff] (!%p4179_p13)  }
 0x354   : > { %v1284_v42 = vmax.f32 %v1282_v34, %v1283_v38  ;;  %v1298_v43 = vmax.f32 %v1296_v35, %v1297_v39  ;;  %v4783_v34 = vld [vmem:[#allocation6 + $0x300] ss:$16 sps:$4 sm:$0xff] (!%p4179_p13)   ;;  %v4784_v35 = vld [vmem:[#allocation6 + $0x124] ss:$16 sps:$4 sm:$0xff] (!%p4179_p13)  }
 0x355   : > { %v1278_v45 = vrot.slane %v1277_v40, 1  ;;  %v1292_v46 = vrot.slane %v1291_v41, 1  ;;  %3030 = vmatpush1.bf16.msra.mxu0 (!%p4179_p13), %v4771_v26  ;;  %v4786_v36 = vld [vmem:[#allocation6 + $0x324] ss:$16 sps:$4 sm:$0xff] (!%p4179_p13)   ;;  %v4788_v37 = vld [vmem:[#allocation6 + $0x120] ss:$16 sps:$4 sm:$0xff] (!%p4179_p13)  }
 0x356   : > { %v1285_v47 = vrot.slane %v1284_v42, 1  ;;  %v1299_v48 = vrot.slane %v1298_v43, 1  ;;  %3031 = vmatprep.subr.bf16.mxu0 (!%p4179_p13), %v4774_v28  ;;  %v4789_v38 = vld [vmem:[#allocation6 + $0x320] ss:$16 sps:$4 sm:$0xff] (!%p4179_p13)   ;;  %v4790_v39 = vld [vmem:[#allocation6 + $0x144] ss:$16 sps:$4 sm:$0xff] (!%p4179_p13)  }
 0x357   : > { %v1279_v49 = vmax.f32 %v1277_v40, %v1278_v45  ;;  %v1293_v50 = vmax.f32 %v1291_v41, %v1292_v46  ;;  %v4792_v40 = vld [vmem:[#allocation6 + $0x344] ss:$16 sps:$4 sm:$0xff] (!%p4179_p13)   ;;  %v4794_v41 = vld [vmem:[#allocation6 + $0x140] ss:$16 sps:$4 sm:$0xff] (!%p4179_p13)   ;;  %v4835_v26 = vld [vmem:[#allocation6 + $0x28] ss:$16 sps:$4 sm:$0xff] (!%p4179_p13)  }
 0x358   : > { %v1286_v51 = vmax.f32 %v1284_v42, %v1285_v47  ;;  %v1300_v52 = vmax.f32 %v1298_v43, %v1299_v48  ;;  %v4795_v42 = vld [vmem:[#allocation6 + $0x340] ss:$16 sps:$4 sm:$0xff] (!%p4179_p13)   ;;  %v4796_v43 = vld [vmem:[#allocation6 + $0x164] ss:$16 sps:$4 sm:$0xff] (!%p4179_p13)   ;;  %v1366_v47 = vld [vmem:[%s5898_s6] sm:$0xff] (!%p4179_p13)  ;;  %v5759_v48 = vsub.s32 (!%p4179_p13), 1, %v5751_v0 }
 0x359   : > { %3032 = vmatpush1.bf16.msra.mxu0 (!%p4179_p13), %v4777_v30  ;;  %v4798_v45 = vld [vmem:[#allocation6 + $0x364] ss:$16 sps:$4 sm:$0xff] (!%p4179_p13)   ;;  %v4826_v20 = vld [vmem:[#allocation6 + $0x400] ss:$16 sps:$4 sm:$0xff] (!%p4179_p13)   ;;  %v4843_v28 = vld [vmem:[#allocation6 + $0x4c] ss:$16 sps:$4 sm:$0xff] (!%p4179_p13)  }
 0x35a   : > { %v1311_v44 = vcombine.low %v1279_v49, %v1286_v51  ;;  %v1312_v53 = vcombine.low %v1293_v50, %v1300_v52  ;;  %3033 = vmatprep.subr.bf16.mxu0 (!%p4179_p13), %v4780_v32  ;;  %v4800_v49 = vld [vmem:[#allocation6 + $0x160] ss:$16 sps:$4 sm:$0xff] (!%p4179_p13)   ;;  %v1384_v52 = vsub.s32 (!%p4179_p13), 3, %v5751_v0  ;;  %v4834_v22 = vld [vmem:[#allocation6 + $0x424] ss:$16 sps:$4 sm:$0xff] (!%p4179_p13)  }
 0x35b   : > { %v4801_v50 = vld [vmem:[#allocation6 + $0x360] ss:$16 sps:$4 sm:$0xff] (!%p4179_p13)   ;;  %v4841_v30 = vld [vmem:[#allocation6 + $0x48] ss:$16 sps:$4 sm:$0xff] (!%p4179_p13)   ;;  %v4849_v32 = vld [vmem:[#allocation6 + $0x6c] ss:$16 sps:$4 sm:$0xff] (!%p4179_p13)  }
 0x35c   : > { %v1333_v54 = vrot.slane %v1311_v44, %v1318_v9  ;;  %v1340_v55 = vrot.slane %v1312_v53, %v1318_v9  ;;  %v4802_v44 = vld [vmem:[#allocation6 + $0x184] ss:$16 sps:$4 sm:$0xff] (!%p4179_p13)  }
 0x35d   : > { %3034 = vmatpush1.bf16.msra.mxu0 (!%p4179_p13), %v4783_v34  ;;  %v4804_v53 = vld [vmem:[#allocation6 + $0x384] ss:$16 sps:$4 sm:$0xff] (!%p4179_p13)   ;;  %v4847_v34 = vld [vmem:[#allocation6 + $0x68] ss:$16 sps:$4 sm:$0xff] (!%p4179_p13)  }
 0x35e   : > { %v1342_v56 = vcombine.low %v1333_v54, %v1340_v55  ;;  %3035 = vmatprep.subr.bf16.mxu0 (!%p4179_p13), %v4786_v36  ;;  %v4806_v55 = vld [vmem:[#allocation6 + $0x180] ss:$16 sps:$4 sm:$0xff] (!%p4179_p13)   ;;  %v4855_v36 = vld [vmem:[#allocation6 + $0x8c] ss:$16 sps:$4 sm:$0xff] (!%p4179_p13)  }
 0x360   : > { %v1356_v58 = vrot.slane %v1342_v56, %v1318_v9  ;;  %1364 = sbr.rel (%p4179_p13) target bundleno = 1834 (0x72a), region = 96  ;;  %v4746_v9 = vld [vmem:[#allocation6 + $0x40] ss:$16 sps:$4 sm:$0xff] (!%p4179_p13)  }
 0x361   : > { %2981 = vmatpush1.bf16.msra.mxu1 (!%p4179_p13), %v4746_v9  ;;  %3036 = vmatpush1.bf16.msra.mxu0 (!%p4179_p13), %v4789_v38  ;;  %v4807_v56 = vld [vmem:[#allocation6 + $0x380] ss:$16 sps:$4 sm:$0xff] (!%p4179_p13)   ;;  %v4822_v9 = vld [vmem:[#allocation6 + $0x3e4] ss:$16 sps:$4 sm:$0xff] (!%p4179_p13)   ;;  %v4853_v38 = vld [vmem:[#allocation6 + $0x88] ss:$16 sps:$4 sm:$0xff] (!%p4179_p13)  }
 0x362   : > { %v1357_v60 = vcombine.low %v1349_v57, %v1356_v58  ;;  %2982 = vmatprep.subr.bf16.mxu1 (!%p4179_p13), %v4748_v11  ;;  %3037 = vmatprep.subr.bf16.mxu0 (!%p4179_p13), %v4792_v40  ;;  %v4861_v40 = vld [vmem:[#allocation6 + $0xac] ss:$16 sps:$4 sm:$0xff] (!%p4179_p13)  }
 0x364   : > { %v1359_v61 = vmax.f32 %v1244_v59, %v1357_v60  ;;  %v4808_v59 = vld [vmem:[#allocation6 + $0x1a4] ss:$16 sps:$4 sm:$0xff] (!%p4179_p13)  }
 0x365   : > { %2983 = vmatpush1.bf16.msra.mxu1 (!%p4179_p13), %v4752_v13  ;;  %3038 = vmatpush1.bf16.msra.mxu0 (!%p4179_p13), %v4795_v42  ;;  %v4810_v60 = vld [vmem:[#allocation6 + $0x3a4] ss:$16 sps:$4 sm:$0xff] (!%p4179_p13)   ;;  %v4824_v13 = vld [vmem:[#allocation6 + $0x1e0] ss:$16 sps:$4 sm:$0xff] (!%p4179_p13)   ;;  %v4859_v42 = vld [vmem:[#allocation6 + $0xa8] ss:$16 sps:$4 sm:$0xff] (!%p4179_p13)  }
 0x366   : > { %1360 = vst [vmem:[#allocation2] sm:$0xff] %v1359_v61  ;;  %2984 = vmatprep.subr.bf16.mxu1 (!%p4179_p13), %v4754_v15  ;;  %3039 = vmatprep.subr.bf16.mxu0 (!%p4179_p13), %v4798_v45  ;;  %v4828_v15 = vld [vmem:[#allocation6 + $0x404] ss:$16 sps:$4 sm:$0xff] (!%p4179_p13)   ;;  %v4867_v45 = vld [vmem:[#allocation6 + $0xcc] ss:$16 sps:$4 sm:$0xff] (!%p4179_p13)  }
 0x369   : > { %2985 = vmatpush1.bf16.msra.mxu1 %v4758_v17  ;;  %3040 = vmatpush1.bf16.msra.mxu0 %v4801_v50  ;;  %v4873_v50 = vld [vmem:[#allocation6 + $0xec] ss:$16 sps:$4 sm:$0xff]  }
 0x36a   : > { %2986 = vmatprep.subr.bf16.mxu1 %v4760_v19  ;;  %3041 = vmatprep.subr.bf16.mxu0 %v4804_v53  ;;  %v4876_v53 = vld [vmem:[#allocation6 + $0x504] ss:$16 sps:$4 sm:$0xff]  }
 0x36d   : > { %2987 = vmatpush1.bf16.msra.mxu1 %v4764_v21  ;;  %v1365_v46 = vld [vmem:[#allocation2] sm:$0xff]  ;;  %3042 = vmatpush1.bf16.msra.mxu0 %v4807_v56  ;;  %v4874_v56 = vld [vmem:[#allocation6 + $0x500] ss:$16 sps:$4 sm:$0xff]  }
 0x36e   : > { %2988 = vmatprep.subr.bf16.mxu1 %v4766_v23  ;;  %v1367_v51 = vadd.f32 %v1366_v47, %v1365_v46  ;;  %3043 = vmatprep.subr.bf16.mxu0 %v4810_v60  ;;  %v4829_v21 = vld [vmem:[#allocation6 + $0x8] ss:$16 sps:$4 sm:$0xff]   ;;  %v4837_v23 = vld [vmem:[#allocation6 + $0x2c] ss:$16 sps:$4 sm:$0xff]   ;;  %v4862_v46 = vld [vmem:[#allocation6 + $0x4c0] ss:$16 sps:$4 sm:$0xff]  }
 0x36f   : > { %v4865_v47 = vld [vmem:[#allocation6 + $0xc8] ss:$16 sps:$4 sm:$0xff]   ;;  %v4880_v60 = vld [vmem:[#allocation6 + $0x520] ss:$16 sps:$4 sm:$0xff]  }
 0x370   : > { %v5762_v54 = vmax.f32 %v1367_v51, 0.0  ;;  %v4868_v51 = vld [vmem:[#allocation6 + $0x4e0] ss:$16 sps:$4 sm:$0xff]  }
 0x371   : > { %2989 = vmatpush1.bf16.msra.mxu1 %v4770_v25  ;;  %3044 = vmatpush1.bf16.msra.mxu0 %v4813_v1  ;;  %v4832_v25 = vld [vmem:[#allocation6 + $0x420] ss:$16 sps:$4 sm:$0xff]   ;;  %v4891_v1 = vld [vmem:[#allocation6 + $0x14c] ss:$16 sps:$4 sm:$0xff]  }
 0x372   : > { %2990 = vmatprep.subr.bf16.mxu1 %v4772_v27  ;;  %v1377_v57 = vrot.slane %v5762_v54, %v5759_v48  ;;  %v1385_v58 = vrot.slane %v5762_v54, %v1384_v52  ;;  %3045 = vmatprep.subr.bf16.mxu0 %v4816_v3  ;;  %v1373_v11 = vrot.slane %v5762_v54, %v5773_v4  ;;  %v4840_v27 = vld [vmem:[#allocation6 + $0x444] ss:$16 sps:$4 sm:$0xff]   ;;  %v4889_v3 = vld [vmem:[#allocation6 + $0x148] ss:$16 sps:$4 sm:$0xff]  }
 0x373   : > { %v1381_v12 = vrot.slane %v5762_v54, %v1380_v5  ;;  %v1393_v17 = vrot.slane %v5762_v54, %v1392_v10  ;;  %v4900_v10 = vld [vmem:[#allocation6 + $0x584] ss:$16 sps:$4 sm:$0xff]  }
 0x374   : > { %v1411_v61 = vpack.c.bf16 %v1377_v57, %v1377_v57  ;;  %v5769_v62 = vpack.c.bf16 %v1385_v58, %v1385_v58  ;;  %v5783_v18 = vpack.c.bf16 %v1373_v11, %v1373_v11  ;;  %v4877_v57 = vld [vmem:[#allocation6 + $0x108] ss:$16 sps:$4 sm:$0xff]   ;;  %v4882_v58 = vld [vmem:[#allocation6 + $0x524] ss:$16 sps:$4 sm:$0xff]   ;;  %v4903_v11 = vld [vmem:[#allocation6 + $0x18c] ss:$16 sps:$4 sm:$0xff]  }
 0x375   : > { %2991 = vmatpush1.bf16.msra.mxu1 %v4776_v29  ;;  %3046 = vmatpush1.bf16.msra.mxu0 %v4819_v7  ;;  %v5785_v19 = vpack.c.bf16 %v1381_v12, %v1381_v12  ;;  %v5787_v24 = vpack.c.bf16 %v1393_v17, %v1393_v17  ;;  %v4838_v29 = vld [vmem:[#allocation6 + $0x440] ss:$16 sps:$4 sm:$0xff]   ;;  %v4897_v7 = vld [vmem:[#allocation6 + $0x16c] ss:$16 sps:$4 sm:$0xff]   ;;  %v4907_v17 = vld [vmem:[#allocation6 + $0x1a8] ss:$16 sps:$4 sm:$0xff]  }
 0x376   : > { %2992 = vmatprep.subr.bf16.mxu1 %v4778_v31  ;;  %3008 = vmatprep.mubr.bf16.mxu1 %v1411_v61  ;;  %v4846_v31 = vld [vmem:[#allocation6 + $0x464] ss:$16 sps:$4 sm:$0xff]   ;;  %v4898_v12 = vld [vmem:[#allocation6 + $0x580] ss:$16 sps:$4 sm:$0xff]  }
 0x377   : > { %3049 = vmatprep.mubr.bf16.mxu0 %v5769_v62  ;;  %3047 = vmatprep.subr.bf16.mxu0 %v4822_v9  ;;  %v4895_v9 = vld [vmem:[#allocation6 + $0x168] ss:$16 sps:$4 sm:$0xff]  }
 0x379   : > { %2993 = vmatpush1.bf16.msra.mxu1 %v4782_v33  ;;  %3048 = vmatpush1.bf16.msra.mxu0 %v4825_v14  ;;  %v4844_v33 = vld [vmem:[#allocation6 + $0x460] ss:$16 sps:$4 sm:$0xff]   ;;  %v4906_v14 = vld [vmem:[#allocation6 + $0x5a4] ss:$16 sps:$4 sm:$0xff]  }
 0x37a   : > { %2994 = vmatprep.subr.bf16.mxu1 %v4784_v35  ;;  %3058 = vmatprep.subr.bf16.mxu0 %v4828_v15  ;;  %v4852_v35 = vld [vmem:[#allocation6 + $0x484] ss:$16 sps:$4 sm:$0xff]   ;;  %v4909_v15 = vld [vmem:[#allocation6 + $0x1ac] ss:$16 sps:$4 sm:$0xff]  }
 0x37c   : > { %3050 = vmatmul.mubr.bf16.vlgmr.msra.gmra.mrb[0].mxu0 %v5785_v19 }
 0x37d   : > { %2995 = vmatpush1.bf16.msra.mxu1 %v4788_v37  ;;  %3059 = vmatpush1.bf16.msra.mxu0 %v4826_v20  ;;  %v4850_v37 = vld [vmem:[#allocation6 + $0x480] ss:$16 sps:$4 sm:$0xff]   ;;  %v4912_v20 = vld [vmem:[#allocation6 + $0x5c4] ss:$16 sps:$4 sm:$0xff]  }
 0x37e   : > { %2996 = vmatprep.subr.bf16.mxu1 %v4790_v39  ;;  %3060 = vmatprep.subr.bf16.mxu0 %v4834_v22  ;;  %v4858_v39 = vld [vmem:[#allocation6 + $0x4a4] ss:$16 sps:$4 sm:$0xff]   ;;  %v1388_v22 = vsub.s32 4, %v5751_v0 }
 0x37f   : > { %3090 = vmatprep.mubr.bf16.mxu0 %v5787_v24 }
 0x381   : > { %2997 = vmatpush1.bf16.msra.mxu1 %v4794_v41  ;;  %3061 = vmatpush1.bf16.msra.mxu0 %v4832_v25  ;;  %v4856_v41 = vld [vmem:[#allocation6 + $0x4a0] ss:$16 sps:$4 sm:$0xff]   ;;  %v4913_v25 = vld [vmem:[#allocation6 + $0x1c8] ss:$16 sps:$4 sm:$0xff]  }
 0x382   : > { %2998 = vmatprep.subr.bf16.mxu1 %v4796_v43  ;;  %3062 = vmatprep.subr.bf16.mxu0 %v4840_v27  ;;  %v4864_v43 = vld [vmem:[#allocation6 + $0x4c4] ss:$16 sps:$4 sm:$0xff]   ;;  %v4921_v27 = vld [vmem:[#allocation6 + $0x1ec] ss:$16 sps:$4 sm:$0xff]  }
 0x385   : > { %2999 = vmatpush1.bf16.msra.mxu1 %v4800_v49  ;;  %3063 = vmatpush1.bf16.msra.mxu0 %v4838_v29  ;;  %v4870_v49 = vld [vmem:[#allocation6 + $0x4e4] ss:$16 sps:$4 sm:$0xff]   ;;  %v1389_v29 = vrot.slane %v5762_v54, %v1388_v22 }
 0x386   : > { %3000 = vmatprep.subr.bf16.mxu1 %v4802_v44  ;;  %3064 = vmatprep.subr.bf16.mxu0 %v4846_v31  ;;  %v4871_v44 = vld [vmem:[#allocation6 + $0xe8] ss:$16 sps:$4 sm:$0xff]   ;;  %v4990_v22 = vld [vmem:[#allocation6 + $0x764] ss:$16 sps:$4 sm:$0xff]  }
 0x387   : > { %v4919_v31 = vld [vmem:[#allocation6 + $0x1e8] ss:$16 sps:$4 sm:$0xff]  }
 0x389   : > { %3001 = vmatpush1.bf16.msra.mxu1 %v4806_v55  ;;  %3065 = vmatpush1.bf16.msra.mxu0 %v4844_v33  ;;  %v4879_v55 = vld [vmem:[#allocation6 + $0x10c] ss:$16 sps:$4 sm:$0xff]  }
 0x38a   : > { %3002 = vmatprep.subr.bf16.mxu1 %v4808_v59  ;;  %3066 = vmatprep.subr.bf16.mxu0 %v4852_v35  ;;  %v4885_v59 = vld [vmem:[#allocation6 + $0x12c] ss:$16 sps:$4 sm:$0xff]   ;;  %v5796_v35 = vpack.c.bf16 %v1389_v29, %v1389_v29  ;;  %v4994_v29 = vld [vmem:[#allocation6 + $0x780] ss:$16 sps:$4 sm:$0xff]  }
 0x38b   : > { %v4927_v33 = vld [vmem:[#allocation6 + $0x20c] ss:$16 sps:$4 sm:$0xff]  }
 0x38d   : > { %3003 = vmatpush1.bf16.msra.mxu1 %v4812_v63  ;;  %3067 = vmatpush1.bf16.msra.mxu0 %v4850_v37  ;;  %v4888_v63 = vld [vmem:[#allocation6 + $0x544] ss:$16 sps:$4 sm:$0xff]   ;;  %v4925_v37 = vld [vmem:[#allocation6 + $0x208] ss:$16 sps:$4 sm:$0xff]  }
 0x38e   : > { %3004 = vmatprep.subr.bf16.mxu1 %v4814_v2  ;;  %3068 = vmatprep.subr.bf16.mxu0 %v4858_v39  ;;  %v4886_v2 = vld [vmem:[#allocation6 + $0x540] ss:$16 sps:$4 sm:$0xff]   ;;  %v4933_v39 = vld [vmem:[#allocation6 + $0x22c] ss:$16 sps:$4 sm:$0xff]  }
 0x391   : > { %3005 = vmatpush1.bf16.msra.mxu1 %v4818_v6  ;;  %3069 = vmatpush1.bf16.msra.mxu0 %v4856_v41  ;;  %v4894_v6 = vld [vmem:[#allocation6 + $0x564] ss:$16 sps:$4 sm:$0xff]   ;;  %v4928_v41 = vld [vmem:[#allocation6 + $0x620] ss:$16 sps:$4 sm:$0xff]  }
 0x392   : > { %3006 = vmatprep.subr.bf16.mxu1 %v4820_v8  ;;  %3070 = vmatprep.subr.bf16.mxu0 %v4864_v43  ;;  %v4892_v8 = vld [vmem:[#allocation6 + $0x560] ss:$16 sps:$4 sm:$0xff]   ;;  %v4936_v43 = vld [vmem:[#allocation6 + $0x644] ss:$16 sps:$4 sm:$0xff]  }
 0x395   : > { %3007 = vmatpush1.bf16.msra.mxu1 %v4824_v13  ;;  %3071 = vmatpush1.bf16.msra.mxu0 %v4862_v46  ;;  %v4901_v13 = vld [vmem:[#allocation6 + $0x188] ss:$16 sps:$4 sm:$0xff]   ;;  %v4934_v46 = vld [vmem:[#allocation6 + $0x640] ss:$16 sps:$4 sm:$0xff]  }
 0x396   : > { %3140 = vmatprep.subr.bf16.mxu1 %v4831_v16  ;;  %3072 = vmatprep.subr.bf16.mxu0 %v4870_v49  ;;  %v4904_v16 = vld [vmem:[#allocation6 + $0x5a0] ss:$16 sps:$4 sm:$0xff]   ;;  %v4942_v49 = vld [vmem:[#allocation6 + $0x664] ss:$16 sps:$4 sm:$0xff]  }
 0x398   : > { %3009 = vmatmul.mubr.bf16.vlgmr.msra.gmra.mrb[0].mxu1 %v5783_v18 }
 0x399   : > { %3141 = vmatpush1.bf16.msra.mxu1 %v4829_v21  ;;  %3172 = vmatprep.mubr.bf16.mxu1 %v1411_v61  ;;  %v4883_v61 = vld [vmem:[#allocation6 + $0x128] ss:$16 sps:$4 sm:$0xff]   ;;  %v4915_v21 = vld [vmem:[#allocation6 + $0x1cc] ss:$16 sps:$4 sm:$0xff]  }
 0x39a   : > { %3142 = vmatprep.subr.bf16.mxu1 %v4837_v23  ;;  %3073 = vmatpush1.bf16.msra.mxu0 %v4868_v51  ;;  %v4910_v23 = vld [vmem:[#allocation6 + $0x5c0] ss:$16 sps:$4 sm:$0xff]   ;;  %v4943_v51 = vld [vmem:[#allocation6 + $0x268] ss:$16 sps:$4 sm:$0xff]  }
 0x39b   : > { %3074 = vmatprep.subr.bf16.mxu0 %v4876_v53  ;;  %v4951_v53 = vld [vmem:[#allocation6 + $0x28c] ss:$16 sps:$4 sm:$0xff]  }
 0x39d   : > { %3143 = vmatpush1.bf16.msra.mxu1 %v4835_v26  ;;  %v4918_v26 = vld [vmem:[#allocation6 + $0x5e4] ss:$16 sps:$4 sm:$0xff]  }
 0x39e   : > { %3144 = vmatprep.subr.bf16.mxu1 %v4843_v28  ;;  %3075 = vmatpush1.bf16.msra.mxu0 %v4874_v56  ;;  %v1400_v28 = vsub.s32 7, %v5751_v0  ;;  %v4954_v56 = vld [vmem:[#allocation6 + $0x6a4] ss:$16 sps:$4 sm:$0xff]  }
 0x39f   : > { %3076 = vmatprep.subr.bf16.mxu0 %v4882_v58  ;;  %v4952_v58 = vld [vmem:[#allocation6 + $0x6a0] ss:$16 sps:$4 sm:$0xff]  }
 0x3a1   : > { %3145 = vmatpush1.bf16.msra.mxu1 %v4841_v30  ;;  %v4916_v30 = vld [vmem:[#allocation6 + $0x5e0] ss:$16 sps:$4 sm:$0xff]  }
 0x3a2   : > { %3146 = vmatprep.subr.bf16.mxu1 %v4849_v32  ;;  %3077 = vmatpush1.bf16.msra.mxu0 %v4880_v60  ;;  %v4924_v32 = vld [vmem:[#allocation6 + $0x604] ss:$16 sps:$4 sm:$0xff]  }
 0x3a3   : > { %3078 = vmatprep.subr.bf16.mxu0 %v4888_v63  ;;  %v4960_v60 = vld [vmem:[#allocation6 + $0x6c4] ss:$16 sps:$4 sm:$0xff]   ;;  %v4958_v63 = vld [vmem:[#allocation6 + $0x6c0] ss:$16 sps:$4 sm:$0xff]  }
 0x3a5   : > { %3147 = vmatpush1.bf16.msra.mxu1 %v4847_v34  ;;  %v1401_v34 = vrot.slane %v5762_v54, %v1400_v28  ;;  %v4999_v28 = vld [vmem:[#allocation6 + $0x38c] ss:$16 sps:$4 sm:$0xff]  }
 0x3a6   : > { %3148 = vmatprep.subr.bf16.mxu1 %v4855_v36  ;;  %3079 = vmatpush1.bf16.msra.mxu0 %v4886_v2  ;;  %v4922_v36 = vld [vmem:[#allocation6 + $0x600] ss:$16 sps:$4 sm:$0xff]   ;;  %v4966_v2 = vld [vmem:[#allocation6 + $0x6e4] ss:$16 sps:$4 sm:$0xff]  }
 0x3a7   : > { %3080 = vmatprep.subr.bf16.mxu0 %v4894_v6  ;;  %v4964_v6 = vld [vmem:[#allocation6 + $0x6e0] ss:$16 sps:$4 sm:$0xff]  }
 0x3a9   : > { %3149 = vmatpush1.bf16.msra.mxu1 %v4853_v38  ;;  %v4930_v38 = vld [vmem:[#allocation6 + $0x624] ss:$16 sps:$4 sm:$0xff]  }
 0x3aa   : > { %3150 = vmatprep.subr.bf16.mxu1 %v4861_v40  ;;  %3081 = vmatpush1.bf16.msra.mxu0 %v4892_v8  ;;  %v5798_v40 = vpack.c.bf16 %v1401_v34, %v1401_v34  ;;  %v4972_v8 = vld [vmem:[#allocation6 + $0x704] ss:$16 sps:$4 sm:$0xff]   ;;  %v5003_v34 = vld [vmem:[#allocation6 + $0x3a8] ss:$16 sps:$4 sm:$0xff]  }
 0x3ab   : > { %3082 = vmatprep.subr.bf16.mxu0 %v4900_v10  ;;  %v4970_v10 = vld [vmem:[#allocation6 + $0x700] ss:$16 sps:$4 sm:$0xff]  }
 0x3ad   : > { %3151 = vmatpush1.bf16.msra.mxu1 %v4859_v42  ;;  %v4931_v42 = vld [vmem:[#allocation6 + $0x228] ss:$16 sps:$4 sm:$0xff]  }
 0x3ae   : > { %3152 = vmatprep.subr.bf16.mxu1 %v4867_v45  ;;  %3083 = vmatpush1.bf16.msra.mxu0 %v4898_v12  ;;  %v4939_v45 = vld [vmem:[#allocation6 + $0x24c] ss:$16 sps:$4 sm:$0xff]   ;;  %v4978_v12 = vld [vmem:[#allocation6 + $0x724] ss:$16 sps:$4 sm:$0xff]  }
 0x3af   : > { %3084 = vmatprep.subr.bf16.mxu0 %v4906_v14  ;;  %v4976_v14 = vld [vmem:[#allocation6 + $0x720] ss:$16 sps:$4 sm:$0xff]  }
 0x3b1   : > { %3153 = vmatpush1.bf16.msra.mxu1 %v4865_v47  ;;  %v4937_v47 = vld [vmem:[#allocation6 + $0x248] ss:$16 sps:$4 sm:$0xff]  }
 0x3b2   : > { %3154 = vmatprep.subr.bf16.mxu1 %v4873_v50  ;;  %3085 = vmatpush1.bf16.msra.mxu0 %v4904_v16  ;;  %v4940_v50 = vld [vmem:[#allocation6 + $0x660] ss:$16 sps:$4 sm:$0xff]   ;;  %v4984_v16 = vld [vmem:[#allocation6 + $0x744] ss:$16 sps:$4 sm:$0xff]  }
 0x3b3   : > { %3086 = vmatprep.subr.bf16.mxu0 %v4912_v20  ;;  %v4982_v20 = vld [vmem:[#allocation6 + $0x740] ss:$16 sps:$4 sm:$0xff]  }
 0x3b5   : > { %3155 = vmatpush1.bf16.msra.mxu1 %v4871_v44  ;;  %v4948_v44 = vld [vmem:[#allocation6 + $0x684] ss:$16 sps:$4 sm:$0xff]  }
 0x3b6   : > { %3156 = vmatprep.subr.bf16.mxu1 %v4879_v55  ;;  %3087 = vmatpush1.bf16.msra.mxu0 %v4910_v23  ;;  %v4946_v55 = vld [vmem:[#allocation6 + $0x680] ss:$16 sps:$4 sm:$0xff]   ;;  %v4993_v23 = vld [vmem:[#allocation6 + $0x36c] ss:$16 sps:$4 sm:$0xff]  }
 0x3b7   : > { %3088 = vmatprep.subr.bf16.mxu0 %v4918_v26  ;;  %v4991_v26 = vld [vmem:[#allocation6 + $0x368] ss:$16 sps:$4 sm:$0xff]  }
 0x3b9   : > { %3157 = vmatpush1.bf16.msra.mxu1 %v4877_v57  ;;  %v4957_v57 = vld [vmem:[#allocation6 + $0x2ac] ss:$16 sps:$4 sm:$0xff]  }
 0x3ba   : > { %3158 = vmatprep.subr.bf16.mxu1 %v4885_v59  ;;  %3089 = vmatpush1.bf16.msra.mxu0 %v4916_v30  ;;  %v4955_v59 = vld [vmem:[#allocation6 + $0x2a8] ss:$16 sps:$4 sm:$0xff]  }
 0x3bb   : > { %3099 = vmatprep.subr.bf16.mxu0 %v4924_v32  ;;  %v4997_v30 = vld [vmem:[#allocation6 + $0x388] ss:$16 sps:$4 sm:$0xff]   ;;  %v5005_v32 = vld [vmem:[#allocation6 + $0x3ac] ss:$16 sps:$4 sm:$0xff]  }
 0x3bd   : > { %3159 = vmatpush1.bf16.msra.mxu1 %v4883_v61  ;;  %3091 = vmatmul.mubr.bf16.vlgmr.msra.gmra.mrb[0].mxu0 %v5796_v35  ;;  %v4963_v61 = vld [vmem:[#allocation6 + $0x2cc] ss:$16 sps:$4 sm:$0xff]  }
 0x3be   : > { %3160 = vmatprep.subr.bf16.mxu1 %v4891_v1  ;;  %3100 = vmatpush1.bf16.msra.mxu0 %v4922_v36  ;;  %v4961_v1 = vld [vmem:[#allocation6 + $0x2c8] ss:$16 sps:$4 sm:$0xff]   ;;  %v5008_v36 = vld [vmem:[#allocation6 + $0x7c4] ss:$16 sps:$4 sm:$0xff]  }
 0x3bf   : > { %3101 = vmatprep.subr.bf16.mxu0 %v4930_v38  ;;  %3131 = vmatprep.mubr.bf16.mxu0 %v5798_v40  ;;  %v5006_v38 = vld [vmem:[#allocation6 + $0x7c0] ss:$16 sps:$4 sm:$0xff]  }
 0x3c1   : > { %3161 = vmatpush1.bf16.msra.mxu1 %v4889_v3  ;;  %v4969_v3 = vld [vmem:[#allocation6 + $0x2ec] ss:$16 sps:$4 sm:$0xff]  }
 0x3c2   : > { %3162 = vmatprep.subr.bf16.mxu1 %v4897_v7  ;;  %3102 = vmatpush1.bf16.msra.mxu0 %v4928_v41  ;;  %v4967_v7 = vld [vmem:[#allocation6 + $0x2e8] ss:$16 sps:$4 sm:$0xff]   ;;  %v1396_v41 = vsub.s32 6, %v5751_v0 }
 0x3c3   : > { %3103 = vmatprep.subr.bf16.mxu0 %v4936_v43  ;;  %v5017_v43 = vld [vmem:[#allocation6 + $0x3ec] ss:$16 sps:$4 sm:$0xff]  }
 0x3c4   : > { %v5225_v0 = vld [vmem:[#allocation9 + $0x38] sm:$0xff]  }
 0x3c5   : > { %3163 = vmatpush1.bf16.msra.mxu1 %v4895_v9  ;;  %v4975_v9 = vld [vmem:[#allocation6 + $0x30c] ss:$16 sps:$4 sm:$0xff]  }
 0x3c6   : > { %3164 = vmatprep.subr.bf16.mxu1 %v4903_v11  ;;  %3104 = vmatpush1.bf16.msra.mxu0 %v4934_v46  ;;  %v4973_v11 = vld [vmem:[#allocation6 + $0x308] ss:$16 sps:$4 sm:$0xff]   ;;  %v1397_v46 = vrot.slane %v5762_v54, %v1396_v41 }
 0x3c7   : > { %3105 = vmatprep.subr.bf16.mxu0 %v4942_v49  ;;  %v5020_v49 = vld [vmem:[#allocation6 + $0x40c] ss:$16 sps:$4 sm:$0xff]   ;;  %v5021_v54 = vld [vmem:[#allocation6 + $0x428] ss:$16 sps:$4 sm:$0xff]  }
 0x3c8   : > { %v5054_v41 = vld [vmem:[#allocation6 + $0x588] ss:$16 sps:$4 sm:$0xff]  }
 0x3c9   : > { %3165 = vmatpush1.bf16.msra.mxu1 %v4901_v13  ;;  %v4981_v13 = vld [vmem:[#allocation6 + $0x32c] ss:$16 sps:$4 sm:$0xff]  }
 0x3ca   : > { %3166 = vmatprep.subr.bf16.mxu1 %v4909_v15  ;;  %3106 = vmatpush1.bf16.msra.mxu0 %v4940_v50  ;;  %v4979_v15 = vld [vmem:[#allocation6 + $0x328] ss:$16 sps:$4 sm:$0xff]   ;;  %v5806_v50 = vpack.c.bf16 %v1397_v46, %v1397_v46 }
 0x3cb   : > { %3107 = vmatprep.subr.bf16.mxu0 %v4948_v44  ;;  %v5114_v44 = vld [vmem:[#allocation8] ss:$8 sps:$4 sm:$0xff]  }
 0x3cc   : > { %v5057_v46 = vld [vmem:[#allocation6 + $0x5a8] ss:$16 sps:$4 sm:$0xff]  }
 0x3cd   : > { %3167 = vmatpush1.bf16.msra.mxu1 %v4907_v17  ;;  %v4987_v17 = vld [vmem:[#allocation6 + $0x34c] ss:$16 sps:$4 sm:$0xff]  }
 0x3ce   : > { %3168 = vmatprep.subr.bf16.mxu1 %v4915_v21  ;;  %3108 = vmatpush1.bf16.msra.mxu0 %v4946_v55  ;;  %v4985_v21 = vld [vmem:[#allocation6 + $0x348] ss:$16 sps:$4 sm:$0xff]   ;;  %v5119_v55 = vld [vmem:[#allocation8 + $0x14] ss:$8 sps:$4 sm:$0xff]  }
 0x3cf   : > { %3109 = vmatprep.subr.bf16.mxu0 %v4954_v56  ;;  %v5117_v56 = vld [vmem:[#allocation8 + $0x10] ss:$8 sps:$4 sm:$0xff]  }
 0x3d1   : > { %3169 = vmatpush1.bf16.msra.mxu1 %v4913_v25  ;;  %v4988_v25 = vld [vmem:[#allocation6 + $0x760] ss:$16 sps:$4 sm:$0xff]  }
 0x3d2   : > { %3170 = vmatprep.subr.bf16.mxu1 %v4921_v27  ;;  %3110 = vmatpush1.bf16.msra.mxu0 %v4952_v58  ;;  %v4996_v27 = vld [vmem:[#allocation6 + $0x784] ss:$16 sps:$4 sm:$0xff]   ;;  %v5024_v58 = vld [vmem:[#allocation6 + $0x448] ss:$16 sps:$4 sm:$0xff]  }
 0x3d3   : > { %3111 = vmatprep.subr.bf16.mxu0 %v4960_v60  ;;  %v5027_v60 = vld [vmem:[#allocation6 + $0x468] ss:$16 sps:$4 sm:$0xff]  }
 0x3d5   : > { %3171 = vmatpush1.bf16.msra.mxu1 %v4919_v31  ;;  %v5002_v31 = vld [vmem:[#allocation6 + $0x7a4] ss:$16 sps:$4 sm:$0xff]  }
 0x3d6   : > { %3181 = vmatprep.subr.bf16.mxu1 %v4927_v33  ;;  %3112 = vmatpush1.bf16.msra.mxu0 %v4958_v63  ;;  %v5000_v33 = vld [vmem:[#allocation6 + $0x7a0] ss:$16 sps:$4 sm:$0xff]   ;;  %v5125_v63 = vld [vmem:[#allocation8 + $0x34] ss:$8 sps:$4 sm:$0xff]  }
 0x3d7   : > { %3113 = vmatprep.subr.bf16.mxu0 %v4966_v2  ;;  %v5030_v2 = vld [vmem:[#allocation6 + $0x488] ss:$16 sps:$4 sm:$0xff]  }
 0x3d8   : > { %3173 = vmatmul.mubr.bf16.vlgmr.msra.gmra.mrb[4].mxu1 %v5783_v18  ;;  %v4945_v18 = vld [vmem:[#allocation6 + $0x26c] ss:$16 sps:$4 sm:$0xff]  }
 0x3d9   : > { %3182 = vmatpush1.bf16.msra.mxu1 %v4925_v37  ;;  %3213 = vmatprep.mubr.bf16.mxu1 %v5769_v62  ;;  %v4949_v62 = vld [vmem:[#allocation6 + $0x288] ss:$16 sps:$4 sm:$0xff]   ;;  %v5011_v37 = vld [vmem:[#allocation6 + $0x3cc] ss:$16 sps:$4 sm:$0xff]  }
 0x3da   : > { %3183 = vmatprep.subr.bf16.mxu1 %v4933_v39  ;;  %3114 = vmatpush1.bf16.msra.mxu0 %v4964_v6  ;;  %v5009_v39 = vld [vmem:[#allocation6 + $0x3c8] ss:$16 sps:$4 sm:$0xff]  }
 0x3db   : > { %3115 = vmatprep.subr.bf16.mxu0 %v4972_v8  ;;  %v5126_v6 = vld [vmem:[#allocation8 + $0x40] ss:$8 sps:$4 sm:$0xff]  }
 0x3dc   : > { %v5033_v8 = vld [vmem:[#allocation6 + $0x4a8] ss:$16 sps:$4 sm:$0xff]  }
 0x3dd   : > { %3184 = vmatpush1.bf16.msra.mxu1 %v4931_v42  ;;  %v5014_v42 = vld [vmem:[#allocation6 + $0x7e4] ss:$16 sps:$4 sm:$0xff]  }
 0x3de   : > { %3185 = vmatprep.subr.bf16.mxu1 %v4939_v45  ;;  %3116 = vmatpush1.bf16.msra.mxu0 %v4970_v10  ;;  %v5012_v45 = vld [vmem:[#allocation6 + $0x7e0] ss:$16 sps:$4 sm:$0xff]  }
 0x3df   : > { %3117 = vmatprep.subr.bf16.mxu0 %v4978_v12  ;;  %v5129_v10 = vld [vmem:[#allocation8 + $0x50] ss:$8 sps:$4 sm:$0xff]  }
 0x3e0   : > { %v5036_v12 = vld [vmem:[#allocation6 + $0x4c8] ss:$16 sps:$4 sm:$0xff]  }
 0x3e1   : > { %3186 = vmatpush1.bf16.msra.mxu1 %v4937_v47  ;;  %v5015_v47 = vld [vmem:[#allocation6 + $0x3e8] ss:$16 sps:$4 sm:$0xff]  }
 0x3e2   : > { %3187 = vmatprep.subr.bf16.mxu1 %v4945_v18  ;;  %3118 = vmatpush1.bf16.msra.mxu0 %v4976_v14  ;;  %v5018_v18 = vld [vmem:[#allocation6 + $0x408] ss:$16 sps:$4 sm:$0xff]  }
 0x3e3   : > { %3119 = vmatprep.subr.bf16.mxu0 %v4984_v16  ;;  %v5132_v14 = vld [vmem:[#allocation8 + $0x60] ss:$8 sps:$4 sm:$0xff]  }
 0x3e4   : > { %v5039_v16 = vld [vmem:[#allocation6 + $0x4e8] ss:$16 sps:$4 sm:$0xff]  }
 0x3e5   : > { %3188 = vmatpush1.bf16.msra.mxu1 %v4943_v51  ;;  %v5023_v51 = vld [vmem:[#allocation6 + $0x42c] ss:$16 sps:$4 sm:$0xff]  }
 0x3e6   : > { %3189 = vmatprep.subr.bf16.mxu1 %v4951_v53  ;;  %3120 = vmatpush1.bf16.msra.mxu0 %v4982_v20  ;;  %v5116_v53 = vld [vmem:[#allocation8 + $0x4] ss:$8 sps:$4 sm:$0xff]   ;;  %v5135_v20 = vld [vmem:[#allocation8 + $0x70] ss:$8 sps:$4 sm:$0xff]  }
 0x3e7   : > { %3121 = vmatprep.subr.bf16.mxu0 %v4990_v22  ;;  %v5042_v22 = vld [vmem:[#allocation6 + $0x508] ss:$16 sps:$4 sm:$0xff]  }
 0x3e9   : > { %3190 = vmatpush1.bf16.msra.mxu1 %v4949_v62  ;;  %v5026_v62 = vld [vmem:[#allocation6 + $0x44c] ss:$16 sps:$4 sm:$0xff]  }
 0x3ea   : > { %3191 = vmatprep.subr.bf16.mxu1 %v4957_v57  ;;  %3122 = vmatpush1.bf16.msra.mxu0 %v4988_v25  ;;  %v5122_v57 = vld [vmem:[#allocation8 + $0x24] ss:$8 sps:$4 sm:$0xff]   ;;  %v5138_v25 = vld [vmem:[#allocation8 + $0x80] ss:$8 sps:$4 sm:$0xff]  }
 0x3eb   : > { %3123 = vmatprep.subr.bf16.mxu0 %v4996_v27  ;;  %v5045_v27 = vld [vmem:[#allocation6 + $0x528] ss:$16 sps:$4 sm:$0xff]  }
 0x3ed   : > { %3192 = vmatpush1.bf16.msra.mxu1 %v4955_v59  ;;  %v5029_v59 = vld [vmem:[#allocation6 + $0x46c] ss:$16 sps:$4 sm:$0xff]  }
 0x3ee   : > { %3193 = vmatprep.subr.bf16.mxu1 %v4963_v61  ;;  %3124 = vmatpush1.bf16.msra.mxu0 %v4994_v29  ;;  %v5032_v61 = vld [vmem:[#allocation6 + $0x48c] ss:$16 sps:$4 sm:$0xff]   ;;  %v5141_v29 = vld [vmem:[#allocation8 + $0x90] ss:$8 sps:$4 sm:$0xff]  }
 0x3ef   : > { %3125 = vmatprep.subr.bf16.mxu0 %v5002_v31  ;;  %v5048_v31 = vld [vmem:[#allocation6 + $0x548] ss:$16 sps:$4 sm:$0xff]  }
 0x3f1   : > { %3194 = vmatpush1.bf16.msra.mxu1 %v4961_v1  ;;  %v5128_v1 = vld [vmem:[#allocation8 + $0x44] ss:$8 sps:$4 sm:$0xff]  }
 0x3f2   : > { %3195 = vmatprep.subr.bf16.mxu1 %v4969_v3  ;;  %3126 = vmatpush1.bf16.msra.mxu0 %v5000_v33  ;;  %v5035_v3 = vld [vmem:[#allocation6 + $0x4ac] ss:$16 sps:$4 sm:$0xff]   ;;  %v5144_v33 = vld [vmem:[#allocation8 + $0xa0] ss:$8 sps:$4 sm:$0xff]  }
 0x3f3   : > { %3127 = vmatprep.subr.bf16.mxu0 %v5008_v36  ;;  %v5051_v36 = vld [vmem:[#allocation6 + $0x568] ss:$16 sps:$4 sm:$0xff]  }
 0x3f5   : > { %3196 = vmatpush1.bf16.msra.mxu1 %v4967_v7  ;;  %v5131_v7 = vld [vmem:[#allocation8 + $0x54] ss:$8 sps:$4 sm:$0xff]  }
 0x3f6   : > { %3197 = vmatprep.subr.bf16.mxu1 %v4975_v9  ;;  %3128 = vmatpush1.bf16.msra.mxu0 %v5006_v38  ;;  %v5038_v9 = vld [vmem:[#allocation6 + $0x4cc] ss:$16 sps:$4 sm:$0xff]   ;;  %v5147_v38 = vld [vmem:[#allocation8 + $0xb0] ss:$8 sps:$4 sm:$0xff]  }
 0x3f7   : > { %3129 = vmatprep.subr.bf16.mxu0 %v5014_v42  ;;  %v5059_v42 = vld [vmem:[#allocation6 + $0x5ac] ss:$16 sps:$4 sm:$0xff]  }
 0x3f9   : > { %3198 = vmatpush1.bf16.msra.mxu1 %v4973_v11  ;;  %v5134_v11 = vld [vmem:[#allocation8 + $0x64] ss:$8 sps:$4 sm:$0xff]  }
 0x3fa   : > { %3199 = vmatprep.subr.bf16.mxu1 %v4981_v13  ;;  %3130 = vmatpush1.bf16.msra.mxu0 %v5012_v45  ;;  %v5041_v13 = vld [vmem:[#allocation6 + $0x4ec] ss:$16 sps:$4 sm:$0xff]  }
 0x3fb   : > { %3708 = vmatprep.subr.bf16.mxu0 %v5116_v53  ;;  %v5155_v45 = vld [vmem:[#allocation8 + $0xd4] ss:$8 sps:$4 sm:$0xff]  }
 0x3fc   : > { %v5068_v53 = vld [vmem:[#allocation6 + $0x60c] ss:$16 sps:$4 sm:$0xff]  }
 0x3fd   : > { %3200 = vmatpush1.bf16.msra.mxu1 %v4979_v15  ;;  %3132 = vmatmul.mubr.bf16.vlgmr.msra.gmra.mrb[0].mxu0 %v5806_v50  ;;  %v5137_v15 = vld [vmem:[#allocation8 + $0x74] ss:$8 sps:$4 sm:$0xff]  }
 0x3fe   : > { %3201 = vmatprep.subr.bf16.mxu1 %v4987_v17  ;;  %3709 = vmatpush1.bf16.msra.mxu0 %v5114_v44  ;;  %v5044_v17 = vld [vmem:[#allocation6 + $0x50c] ss:$16 sps:$4 sm:$0xff]   ;;  %v5063_v44 = vld [vmem:[#allocation6 + $0x5e8] ss:$16 sps:$4 sm:$0xff]  }
 0x3ff   : > { %3710 = vmatprep.subr.bf16.mxu0 %v5119_v55  ;;  %v5071_v55 = vld [vmem:[#allocation6 + $0x62c] ss:$16 sps:$4 sm:$0xff]  }
 0x401   : > { %3202 = vmatpush1.bf16.msra.mxu1 %v4985_v21  ;;  %v5140_v21 = vld [vmem:[#allocation8 + $0x84] ss:$8 sps:$4 sm:$0xff]  }
 0x402   : > { %3203 = vmatprep.subr.bf16.mxu1 %v4993_v23  ;;  %3711 = vmatpush1.bf16.msra.mxu0 %v5117_v56  ;;  %v5047_v23 = vld [vmem:[#allocation6 + $0x52c] ss:$16 sps:$4 sm:$0xff]  }
 0x403   : > { %3712 = vmatprep.subr.bf16.mxu0 %v5122_v57  ;;  %v5074_v56 = vld [vmem:[#allocation6 + $0x64c] ss:$16 sps:$4 sm:$0xff]   ;;  %v5072_v57 = vld [vmem:[#allocation6 + $0x648] ss:$16 sps:$4 sm:$0xff]  }
 0x405   : > { %3204 = vmatpush1.bf16.msra.mxu1 %v4991_v26  ;;  %v5143_v26 = vld [vmem:[#allocation8 + $0x94] ss:$8 sps:$4 sm:$0xff]  }
 0x406   : > { %3205 = vmatprep.subr.bf16.mxu1 %v4999_v28  ;;  %v5050_v28 = vld [vmem:[#allocation6 + $0x54c] ss:$16 sps:$4 sm:$0xff]  }
 0x409   : > { %3206 = vmatpush1.bf16.msra.mxu1 %v4997_v30  ;;  %v5146_v30 = vld [vmem:[#allocation8 + $0xa4] ss:$8 sps:$4 sm:$0xff]  }
 0x40a   : > { %3207 = vmatprep.subr.bf16.mxu1 %v5005_v32  ;;  %v5053_v32 = vld [vmem:[#allocation6 + $0x56c] ss:$16 sps:$4 sm:$0xff]  }
 0x40d   : > { %3208 = vmatpush1.bf16.msra.mxu1 %v5003_v34  ;;  %v5149_v34 = vld [vmem:[#allocation8 + $0xb4] ss:$8 sps:$4 sm:$0xff]  }
 0x40e   : > { %3209 = vmatprep.subr.bf16.mxu1 %v5011_v37  ;;  %v5056_v37 = vld [vmem:[#allocation6 + $0x58c] ss:$16 sps:$4 sm:$0xff]  }
 0x411   : > { %3210 = vmatpush1.bf16.msra.mxu1 %v5009_v39  ;;  %v5152_v39 = vld [vmem:[#allocation8 + $0xc4] ss:$8 sps:$4 sm:$0xff]  }
 0x412   : > { %3211 = vmatprep.subr.bf16.mxu1 %v5017_v43  ;;  %v5150_v43 = vld [vmem:[#allocation8 + $0xc0] ss:$8 sps:$4 sm:$0xff]  }
 0x415   : > { %3212 = vmatpush1.bf16.msra.mxu1 %v5015_v47  ;;  %v5062_v47 = vld [vmem:[#allocation6 + $0x5cc] ss:$16 sps:$4 sm:$0xff]  }
 0x416   : > { %3222 = vmatprep.subr.bf16.mxu1 %v5020_v49  ;;  %v5153_v49 = vld [vmem:[#allocation8 + $0xd0] ss:$8 sps:$4 sm:$0xff]  }
 0x418   : > { %3214 = vmatmul.mubr.bf16.vlgmr.msra.gmra.mrb[4].mxu1 %v5785_v19  ;;  %v5120_v19 = vld [vmem:[#allocation8 + $0x20] ss:$8 sps:$4 sm:$0xff]  }
 0x419   : > { %3223 = vmatpush1.bf16.msra.mxu1 %v5018_v18  ;;  %3254 = vmatprep.mubr.bf16.mxu1 %v5787_v24  ;;  %v5123_v24 = vld [vmem:[#allocation8 + $0x30] ss:$8 sps:$4 sm:$0xff]  }
 0x41a   : > { %3224 = vmatprep.subr.bf16.mxu1 %v5023_v51  ;;  %3713 = vmatpush1.bf16.msra.mxu0 %v5120_v19  ;;  %v5060_v18 = vld [vmem:[#allocation6 + $0x5c8] ss:$16 sps:$4 sm:$0xff]   ;;  %v5065_v51 = vld [vmem:[#allocation6 + $0x5ec] ss:$16 sps:$4 sm:$0xff]  }
 0x41b   : > { %3714 = vmatprep.subr.bf16.mxu0 %v5125_v63  ;;  %v5080_v19 = vld [vmem:[#allocation6 + $0x68c] ss:$16 sps:$4 sm:$0xff]  }
 0x41c   : > { %v5086_v63 = vld [vmem:[#allocation6 + $0x6cc] ss:$16 sps:$4 sm:$0xff]  }
 0x41d   : > { %3225 = vmatpush1.bf16.msra.mxu1 %v5021_v54  ;;  %v5066_v54 = vld [vmem:[#allocation6 + $0x608] ss:$16 sps:$4 sm:$0xff]  }
 0x41e   : > { %3226 = vmatprep.subr.bf16.mxu1 %v5026_v62  ;;  %3715 = vmatpush1.bf16.msra.mxu0 %v5123_v24  ;;  %v5069_v62 = vld [vmem:[#allocation6 + $0x628] ss:$16 sps:$4 sm:$0xff]   ;;  %v5158_v24 = vld [vmem:[#allocation8 + $0xe4] ss:$8 sps:$4 sm:$0xff]  }
 0x41f   : > { %3716 = vmatprep.subr.bf16.mxu0 %v5128_v1  ;;  %v5156_v1 = vld [vmem:[#allocation8 + $0xe0] ss:$8 sps:$4 sm:$0xff]  }
 0x421   : > { %3227 = vmatpush1.bf16.msra.mxu1 %v5024_v58  ;;  %v5077_v58 = vld [vmem:[#allocation6 + $0x66c] ss:$16 sps:$4 sm:$0xff]  }
 0x422   : > { %3228 = vmatprep.subr.bf16.mxu1 %v5029_v59  ;;  %3717 = vmatpush1.bf16.msra.mxu0 %v5126_v6  ;;  %v5075_v59 = vld [vmem:[#allocation6 + $0x668] ss:$16 sps:$4 sm:$0xff]  }
 0x423   : > { %3718 = vmatprep.subr.bf16.mxu0 %v5131_v7  ;;  %v5084_v6 = vld [vmem:[#allocation6 + $0x6c8] ss:$16 sps:$4 sm:$0xff]  }
 0x425   : > { %3229 = vmatpush1.bf16.msra.mxu1 %v5027_v60  ;;  %v5078_v60 = vld [vmem:[#allocation6 + $0x688] ss:$16 sps:$4 sm:$0xff]  }
 0x426   : > { %3230 = vmatprep.subr.bf16.mxu1 %v5032_v61  ;;  %3719 = vmatpush1.bf16.msra.mxu0 %v5129_v10  ;;  %v5083_v61 = vld [vmem:[#allocation6 + $0x6ac] ss:$16 sps:$4 sm:$0xff]   ;;  %v5159_v10 = vld [vmem:[#allocation8 + $0xf0] ss:$8 sps:$4 sm:$0xff]  }
 0x427   : > { %3720 = vmatprep.subr.bf16.mxu0 %v5134_v11  ;;  %v5087_v11 = vld [vmem:[#allocation6 + $0x6e8] ss:$16 sps:$4 sm:$0xff]  }
 0x429   : > { %3231 = vmatpush1.bf16.msra.mxu1 %v5030_v2 }
 0x42a   : > { %3232 = vmatprep.subr.bf16.mxu1 %v5035_v3  ;;  %3721 = vmatpush1.bf16.msra.mxu0 %v5132_v14  ;;  %v5090_v14 = vld [vmem:[#allocation6 + $0x708] ss:$16 sps:$4 sm:$0xff]  }
 0x42b   : > { %3722 = vmatprep.subr.bf16.mxu0 %v5137_v15  ;;  %v5095_v15 = vld [vmem:[#allocation6 + $0x72c] ss:$16 sps:$4 sm:$0xff]  }
 0x42d   : > { %3233 = vmatpush1.bf16.msra.mxu1 %v5033_v8  ;;  %v5089_v8 = vld [vmem:[#allocation6 + $0x6ec] ss:$16 sps:$4 sm:$0xff]  }
 0x42e   : > { %3234 = vmatprep.subr.bf16.mxu1 %v5038_v9  ;;  %3723 = vmatpush1.bf16.msra.mxu0 %v5135_v20  ;;  %v5161_v9 = vld [vmem:[#allocation8 + $0xf4] ss:$8 sps:$4 sm:$0xff]   ;;  %v5096_v20 = vld [vmem:[#allocation6 + $0x748] ss:$16 sps:$4 sm:$0xff]  }
 0x42f   : > { %3724 = vmatprep.subr.bf16.mxu0 %v5140_v21  ;;  %v5101_v21 = vld [vmem:[#allocation6 + $0x76c] ss:$16 sps:$4 sm:$0xff]  }
 0x431   : > { %3235 = vmatpush1.bf16.msra.mxu1 %v5036_v12  ;;  %v5092_v12 = vld [vmem:[#allocation6 + $0x70c] ss:$16 sps:$4 sm:$0xff]  }
 0x432   : > { %3236 = vmatprep.subr.bf16.mxu1 %v5041_v13  ;;  %3725 = vmatpush1.bf16.msra.mxu0 %v5138_v25  ;;  %v5164_v13 = vld [vmem:[#allocation8 + $0x104] ss:$8 sps:$4 sm:$0xff]   ;;  %v5102_v25 = vld [vmem:[#allocation6 + $0x788] ss:$16 sps:$4 sm:$0xff]  }
 0x433   : > { %3726 = vmatprep.subr.bf16.mxu0 %v5143_v26  ;;  %v5107_v26 = vld [vmem:[#allocation6 + $0x7ac] ss:$16 sps:$4 sm:$0xff]  }
 0x435   : > { %3237 = vmatpush1.bf16.msra.mxu1 %v5039_v16  ;;  %v5093_v16 = vld [vmem:[#allocation6 + $0x728] ss:$16 sps:$4 sm:$0xff]  }
 0x436   : > { %3238 = vmatprep.subr.bf16.mxu1 %v5044_v17  ;;  %3727 = vmatpush1.bf16.msra.mxu0 %v5141_v29  ;;  %v5098_v17 = vld [vmem:[#allocation6 + $0x74c] ss:$16 sps:$4 sm:$0xff]   ;;  %v5108_v29 = vld [vmem:[#allocation6 + $0x7c8] ss:$16 sps:$4 sm:$0xff]  }
 0x437   : > { %3728 = vmatprep.subr.bf16.mxu0 %v5146_v30  ;;  %v5113_v30 = vld [vmem:[#allocation6 + $0x7ec] ss:$16 sps:$4 sm:$0xff]  }
 0x439   : > { %3239 = vmatpush1.bf16.msra.mxu1 %v5042_v22  ;;  %v5099_v22 = vld [vmem:[#allocation6 + $0x768] ss:$16 sps:$4 sm:$0xff]  }
 0x43a   : > { %3240 = vmatprep.subr.bf16.mxu1 %v5047_v23  ;;  %3729 = vmatpush1.bf16.msra.mxu0 %v5144_v33  ;;  %v5104_v23 = vld [vmem:[#allocation6 + $0x78c] ss:$16 sps:$4 sm:$0xff]  }
 0x43b   : > { %3730 = vmatprep.subr.bf16.mxu0 %v5149_v34 }
 0x43d   : > { %3241 = vmatpush1.bf16.msra.mxu1 %v5045_v27  ;;  %v5105_v27 = vld [vmem:[#allocation6 + $0x7a8] ss:$16 sps:$4 sm:$0xff]  }
 0x43e   : > { %3242 = vmatprep.subr.bf16.mxu1 %v5050_v28  ;;  %3731 = vmatpush1.bf16.msra.mxu0 %v5147_v38  ;;  %v5110_v28 = vld [vmem:[#allocation6 + $0x7cc] ss:$16 sps:$4 sm:$0xff]  }
 0x43f   : > { %3732 = vmatprep.subr.bf16.mxu0 %v5152_v39 }
 0x441   : > { %3243 = vmatpush1.bf16.msra.mxu1 %v5048_v31  ;;  %v5111_v31 = vld [vmem:[#allocation6 + $0x7e8] ss:$16 sps:$4 sm:$0xff]  }
 0x442   : > { %3244 = vmatprep.subr.bf16.mxu1 %v5053_v32  ;;  %3733 = vmatpush1.bf16.msra.mxu0 %v5150_v43  ;;  %v5817_v32 = vld [vmem:[%s5943_s25] sm:$0xf] }
 0x443   : > { %3734 = vmatprep.subr.bf16.mxu0 %v5155_v45  ;;  %v2959_v33 = vrot.slane %v5817_v32, %v5773_v4  ;;  %v2963_v34 = vrot.slane %v5817_v32, %v5759_v48 }
 0x445   : > { %3245 = vmatpush1.bf16.msra.mxu1 %v5051_v36 }
 0x446   : > { %3246 = vmatprep.subr.bf16.mxu1 %v5056_v37  ;;  %3735 = vmatpush1.bf16.msra.mxu0 %v5153_v49  ;;  %v5162_v49 = vld [vmem:[#allocation8 + $0x100] ss:$8 sps:$4 sm:$0xff]  }
 0x447   : > { %3736 = vmatprep.subr.bf16.mxu0 %v5158_v24  ;;  %v5218_v24 = vld [vmem:[#allocation9 + $0x60] sm:$0xff]  }
 0x449   : > { %3247 = vmatpush1.bf16.msra.mxu1 %v5054_v41 }
 0x44a   : > { %3248 = vmatprep.subr.bf16.mxu1 %v5059_v42  ;;  %3737 = vmatpush1.bf16.msra.mxu0 %v5156_v1  ;;  %v5179_v1 = vld [vmem:[#allocation8 + $0x154] ss:$8 sps:$4 sm:$0xff]  }
 0x44b   : > { %3738 = vmatprep.subr.bf16.mxu0 %v5161_v9  ;;  %v5180_v9 = vld [vmem:[#allocation8 + $0x160] ss:$8 sps:$4 sm:$0xff]  }
 0x44d   : > { %3249 = vmatpush1.bf16.msra.mxu1 %v5057_v46 }
 0x44e   : > { %3250 = vmatprep.subr.bf16.mxu1 %v5062_v47  ;;  %3739 = vmatpush1.bf16.msra.mxu0 %v5159_v10  ;;  %v5185_v10 = vld [vmem:[#allocation8 + $0x174] ss:$8 sps:$4 sm:$0xff]  }
 0x44f   : > { %3749 = vmatprep.subr.bf16.mxu0 %v5164_v13  ;;  %v5186_v13 = vld [vmem:[#allocation8 + $0x180] ss:$8 sps:$4 sm:$0xff]  }
 0x451   : > { %3251 = vmatpush1.bf16.msra.mxu1 %v5060_v18 }
 0x452   : > { %3252 = vmatprep.subr.bf16.mxu1 %v5065_v51  ;;  %v5167_v51 = vld [vmem:[#allocation8 + $0x114] ss:$8 sps:$4 sm:$0xff]  }
 0x455   : > { %3253 = vmatpush1.bf16.msra.mxu1 %v5063_v44  ;;  %v5210_v44 = vld [vmem:[#allocation9 + $0x40] sm:$0xff]  }
 0x456   : > { %3263 = vmatprep.subr.bf16.mxu1 %v5068_v53  ;;  %v5211_v53 = vld [vmem:[#allocation9] sm:$0xff]  }
 0x458   : > { %3255 = vmatmul.mubr.bf16.vlgmr.msra.gmra.mrb[4].mxu1 %v5796_v35  ;;  %v5081_v35 = vld [vmem:[#allocation6 + $0x6a8] ss:$16 sps:$4 sm:$0xff]  }
 0x459   : > { %3264 = vmatpush1.bf16.msra.mxu1 %v5066_v54  ;;  %3295 = vmatprep.mubr.bf16.mxu1 %v5798_v40  ;;  %v5212_v54 = vld [vmem:[#allocation9 + $0x48] sm:$0xff]  }
 0x45a   : > { %3265 = vmatprep.subr.bf16.mxu1 %v5071_v55  ;;  %v5165_v55 = vld [vmem:[#allocation8 + $0x110] ss:$8 sps:$4 sm:$0xff]  }
 0x45d   : > { %3266 = vmatpush1.bf16.msra.mxu1 %v5069_v62  ;;  %v5170_v62 = vld [vmem:[#allocation8 + $0x124] ss:$8 sps:$4 sm:$0xff]  }
 0x45e   : > { %3267 = vmatprep.subr.bf16.mxu1 %v5074_v56  ;;  %v5213_v56 = vld [vmem:[#allocation9 + $0x8] sm:$0xff]  }
 0x461   : > { %3268 = vmatpush1.bf16.msra.mxu1 %v5072_v57  ;;  %v5214_v57 = vld [vmem:[#allocation9 + $0x50] sm:$0xff]  }
 0x462   : > { %3269 = vmatprep.subr.bf16.mxu1 %v5077_v58  ;;  %v5168_v58 = vld [vmem:[#allocation8 + $0x120] ss:$8 sps:$4 sm:$0xff]  }
 0x465   : > { %3270 = vmatpush1.bf16.msra.mxu1 %v5075_v59  ;;  %v5173_v59 = vld [vmem:[#allocation8 + $0x134] ss:$8 sps:$4 sm:$0xff]  }
 0x466   : > { %3271 = vmatprep.subr.bf16.mxu1 %v5080_v19  ;;  %v5215_v19 = vld [vmem:[#allocation9 + $0x10] sm:$0xff]  }
 0x469   : > { %3272 = vmatpush1.bf16.msra.mxu1 %v5078_v60  ;;  %v5216_v60 = vld [vmem:[#allocation9 + $0x58] sm:$0xff]  }
 0x46a   : > { %3273 = vmatprep.subr.bf16.mxu1 %v5083_v61  ;;  %v5171_v61 = vld [vmem:[#allocation8 + $0x130] ss:$8 sps:$4 sm:$0xff]  }
 0x46b   : > { %v3010_v40 = vpop.f32.mrb[0].mxu1 }
 0x46c   : > { %v3012_v2 = vpop.f32.mrb[1].mxu1  ;;  %v3011_v36 = vadd.f32 %v3010_v40, %v2959_v33  ;;  %v5174_v40 = vld [vmem:[#allocation8 + $0x140] ss:$8 sps:$4 sm:$0xff]   ;;  %v2971_v33 = vrot.slane %v5817_v32, %v1384_v52  ;;  %v3376_v52 = vld [vmem:[%s5944_s12] sm:$0x3] }
 0x46d   : > { %v3014_v3 = vpop.f32.mrb[2].mxu1  ;;  %3274 = vmatpush1.bf16.msra.mxu1 %v5081_v35  ;;  %v3013_v37 = vadd.f32 %v3012_v2, %v2963_v34  ;;  %v5176_v35 = vld [vmem:[#allocation8 + $0x144] ss:$8 sps:$4 sm:$0xff]  }
 0x46e   : > { %v3015_v7 = vpop.f32.mrb[3].mxu1  ;;  %3275 = vmatprep.subr.bf16.mxu1 %v5086_v63  ;;  %v5217_v63 = vld [vmem:[#allocation9 + $0x18] sm:$0xff]   ;;  %v5219_v2 = vld [vmem:[#allocation9 + $0x20] sm:$0xff]   ;;  %v5220_v3 = vld [vmem:[#allocation9 + $0x68] sm:$0xff]  }
 0x46f   : > { %v5182_v7 = vld [vmem:[#allocation8 + $0x164] ss:$8 sps:$4 sm:$0xff]  }
 0x471   : > { %3276 = vmatpush1.bf16.msra.mxu1 %v5084_v6  ;;  %v5177_v6 = vld [vmem:[#allocation8 + $0x150] ss:$8 sps:$4 sm:$0xff]  }
 0x472   : > { %3277 = vmatprep.subr.bf16.mxu1 %v5089_v8  ;;  %v5221_v8 = vld [vmem:[#allocation9 + $0x28] sm:$0xff]  }
 0x475   : > { %3278 = vmatpush1.bf16.msra.mxu1 %v5087_v11  ;;  %v5183_v11 = vld [vmem:[#allocation8 + $0x170] ss:$8 sps:$4 sm:$0xff]  }
 0x476   : > { %3279 = vmatprep.subr.bf16.mxu1 %v5092_v12  ;;  %v5188_v12 = vld [vmem:[#allocation8 + $0x184] ss:$8 sps:$4 sm:$0xff]  }
 0x479   : > { %3280 = vmatpush1.bf16.msra.mxu1 %v5090_v14  ;;  %v5191_v14 = vld [vmem:[#allocation8 + $0x194] ss:$8 sps:$4 sm:$0xff]  }
 0x47a   : > { %3281 = vmatprep.subr.bf16.mxu1 %v5095_v15  ;;  %v5189_v15 = vld [vmem:[#allocation8 + $0x190] ss:$8 sps:$4 sm:$0xff]  }
 0x47d   : > { %3282 = vmatpush1.bf16.msra.mxu1 %v5093_v16  ;;  %v5194_v16 = vld [vmem:[#allocation8 + $0x1a4] ss:$8 sps:$4 sm:$0xff]  }
 0x47e   : > { %3283 = vmatprep.subr.bf16.mxu1 %v5098_v17  ;;  %v5192_v17 = vld [vmem:[#allocation8 + $0x1a0] ss:$8 sps:$4 sm:$0xff]  }
 0x481   : > { %3284 = vmatpush1.bf16.msra.mxu1 %v5096_v20  ;;  %v5197_v20 = vld [vmem:[#allocation8 + $0x1b4] ss:$8 sps:$4 sm:$0xff]  }
 0x482   : > { %3285 = vmatprep.subr.bf16.mxu1 %v5101_v21  ;;  %v5195_v21 = vld [vmem:[#allocation8 + $0x1b0] ss:$8 sps:$4 sm:$0xff]  }
 0x485   : > { %3286 = vmatpush1.bf16.msra.mxu1 %v5099_v22  ;;  %v5200_v22 = vld [vmem:[#allocation8 + $0x1c4] ss:$8 sps:$4 sm:$0xff]  }
 0x486   : > { %3287 = vmatprep.subr.bf16.mxu1 %v5104_v23  ;;  %v5198_v23 = vld [vmem:[#allocation8 + $0x1c0] ss:$8 sps:$4 sm:$0xff]  }
 0x489   : > { %3288 = vmatpush1.bf16.msra.mxu1 %v5102_v25  ;;  %v5203_v25 = vld [vmem:[#allocation8 + $0x1d4] ss:$8 sps:$4 sm:$0xff]  }
 0x48a   : > { %3289 = vmatprep.subr.bf16.mxu1 %v5107_v26  ;;  %v5201_v26 = vld [vmem:[#allocation8 + $0x1d0] ss:$8 sps:$4 sm:$0xff]  }
 0x48d   : > { %3290 = vmatpush1.bf16.msra.mxu1 %v5105_v27  ;;  %v5206_v27 = vld [vmem:[#allocation8 + $0x1e4] ss:$8 sps:$4 sm:$0xff]  }
 0x48e   : > { %3291 = vmatprep.subr.bf16.mxu1 %v5110_v28  ;;  %v5204_v28 = vld [vmem:[#allocation8 + $0x1e0] ss:$8 sps:$4 sm:$0xff]  }
 0x491   : > { %3292 = vmatpush1.bf16.msra.mxu1 %v5108_v29  ;;  %v5209_v29 = vld [vmem:[#allocation8 + $0x1f4] ss:$8 sps:$4 sm:$0xff]  }
 0x492   : > { %3293 = vmatprep.subr.bf16.mxu1 %v5113_v30  ;;  %v5207_v30 = vld [vmem:[#allocation8 + $0x1f0] ss:$8 sps:$4 sm:$0xff]  }
 0x495   : > { %3294 = vmatpush1.bf16.msra.mxu1 %v5111_v31  ;;  %v2967_v31 = vrot.slane %v5817_v32, %v1380_v5  ;;  %v5224_v5 = vld [vmem:[#allocation9 + $0x78] sm:$0xff]   ;;  %v3701_v32 = vrot.slane %v3376_v52, %v5773_v4 }
 0x496   : > { %4526 = vmatprep.subr.bf16.mxu1 %v5210_v44  ;;  %v3826_v4 = vld [vmem:[%s5945_s10] sm:$0x1] }
 0x498   : > { %3296 = vmatmul.mubr.bf16.vlgmr.msra.gmra.mrb[4].mxu1 %v5806_v50 }
 0x499   : > { %4527 = vmatpush3.bf16.msra.mxu1 %v5211_v53 }
 0x49a   : > { %4528 = vmatprep.subr.bf16.mxu1 %v5212_v54 }
 0x49d   : > { %4529 = vmatpush3.bf16.msra.mxu1 %v5213_v56 }
 0x49e   : > { %4530 = vmatprep.subr.bf16.mxu1 %v5214_v57 }
 0x4a1   : > { %4531 = vmatpush3.bf16.msra.mxu1 %v5215_v19 }
 0x4a2   : > { %4532 = vmatprep.subr.bf16.mxu1 %v5216_v60 }
 0x4a5   : > { %4533 = vmatpush3.bf16.msra.mxu1 %v5217_v63 }
 0x4a6   : > { %4534 = vmatprep.subr.bf16.mxu1 %v5218_v24 }
 0x4a9   : > { %4535 = vmatpush3.bf16.msra.mxu1 %v5219_v2 }
 0x4aa   : > { %4536 = vmatprep.subr.bf16.mxu1 %v5220_v3 }
 0x4ad   : > { %4537 = vmatpush3.bf16.msra.mxu1 %v5221_v8 }
 0x4d0   : > { %v3133_v38 = vpop.f32.mrb[0].mxu0 }
 0x4d1   : > { %v4567_v39 = vadd.f32 %v3133_v38, %v3011_v36  ;;  %v3135_v41 = vpop.f32.mrb[1].mxu0 }
 0x4d2   : > { %v4569_v42 = vadd.f32 %v3135_v41, %v3013_v37  ;;  %v3137_v43 = vpop.f32.mrb[2].mxu0 }
 0x4d3   : > { %v3304_v45 = vmax.f32 %v4567_v39, 0.0  ;;  %v3138_v50 = vpop.f32.mrb[3].mxu0 }
 0x4d4   : > { %v3305_v46 = vmax.f32 %v4569_v42, 0.0 }
 0x4d5   : > { %v3308_v18 = vpack.c.bf16 %v3304_v45, %v3304_v45 }
 0x4d6   : > { %v3309_v47 = vpack.c.bf16 %v3305_v46, %v3305_v46  ;;  %v5222_v46 = vld [vmem:[#allocation9 + $0x70] sm:$0xff]  }
 0x4d7   : > { %4538 = vmatprep.subr.bf16.mxu1 %v5222_v46 }
 0x4d8   : > { %3740 = vmatprep.mubr.bf16.mxu0 %v3309_v47  ;;  %v5223_v47 = vld [vmem:[#allocation9 + $0x30] sm:$0xff]  }
 0x4d9   : > { %3741 = vmatmul.mubr.bf16.vlgmr.msra.gmra.mrb[4].mxu0 %v3308_v18  ;;  %4539 = vmatpush3.bf16.msra.mxu1 %v5223_v47 }
 0x4da   : > { %3750 = vmatpush1.bf16.msra.mxu0 %v5162_v49  ;;  %4540 = vmatprep.subr.bf16.mxu1 %v5224_v5  ;;  %v3705_v49 = vrot.slane %v3376_v52, %v5759_v48 }
 0x4db   : > { %3751 = vmatprep.subr.bf16.mxu0 %v5167_v51 }
 0x4dd   : > { %4541 = vmatpush3.bf16.msra.mxu1 %v5225_v0 }
 0x4de   : > { %3752 = vmatpush1.bf16.msra.mxu0 %v5165_v55 }
 0x4df   : > { %3753 = vmatprep.subr.bf16.mxu0 %v5170_v62 }
 0x4e2   : > { %3754 = vmatpush1.bf16.msra.mxu0 %v5168_v58 }
 0x4e3   : > { %3755 = vmatprep.subr.bf16.mxu0 %v5173_v59 }
 0x4e6   : > { %3756 = vmatpush1.bf16.msra.mxu0 %v5171_v61 }
 0x4e7   : > { %3757 = vmatprep.subr.bf16.mxu0 %v5176_v35 }
 0x4ea   : > { %3758 = vmatpush1.bf16.msra.mxu0 %v5174_v40 }
 0x4eb   : > { %3759 = vmatprep.subr.bf16.mxu0 %v5179_v1 }
 0x4ee   : > { %3760 = vmatpush1.bf16.msra.mxu0 %v5177_v6 }
 0x4ef   : > { %3761 = vmatprep.subr.bf16.mxu0 %v5182_v7 }
 0x4f2   : > { %3762 = vmatpush1.bf16.msra.mxu0 %v5180_v9 }
 0x4f3   : > { %3763 = vmatprep.subr.bf16.mxu0 %v5185_v10 }
 0x4f6   : > { %3764 = vmatpush1.bf16.msra.mxu0 %v5183_v11 }
 0x4f7   : > { %3765 = vmatprep.subr.bf16.mxu0 %v5188_v12 }
 0x4fa   : > { %3766 = vmatpush1.bf16.msra.mxu0 %v5186_v13 }
 0x4fb   : > { %3767 = vmatprep.subr.bf16.mxu0 %v5191_v14 }
 0x4fe   : > { %3768 = vmatpush1.bf16.msra.mxu0 %v5189_v15 }
 0x4ff   : > { %3769 = vmatprep.subr.bf16.mxu0 %v5194_v16 }
 0x502   : > { %3770 = vmatpush1.bf16.msra.mxu0 %v5192_v17 }
 0x503   : > { %3771 = vmatprep.subr.bf16.mxu0 %v5197_v20 }
 0x506   : > { %3772 = vmatpush1.bf16.msra.mxu0 %v5195_v21 }
 0x507   : > { %3773 = vmatprep.subr.bf16.mxu0 %v5200_v22 }
 0x50a   : > { %3774 = vmatpush1.bf16.msra.mxu0 %v5198_v23 }
 0x50b   : > { %3775 = vmatprep.subr.bf16.mxu0 %v5203_v25 }
 0x50e   : > { %3776 = vmatpush1.bf16.msra.mxu0 %v5201_v26 }
 0x50f   : > { %3777 = vmatprep.subr.bf16.mxu0 %v5206_v27 }
 0x512   : > { %3778 = vmatpush1.bf16.msra.mxu0 %v5204_v28 }
 0x513   : > { %3779 = vmatprep.subr.bf16.mxu0 %v5209_v29 }
 0x516   : > { %3780 = vmatpush1.bf16.msra.mxu0 %v5207_v30 }
 0x56b   : > { %v3297_v34 = vpop.f32.mrb[4].mxu1 }
 0x56c   : > { %v4570_v36 = vadd.f32 %v3297_v34, %v2967_v31  ;;  %v3299_v37 = vpop.f32.mrb[5].mxu1 }
 0x56d   : > { %v4571_v38 = vadd.f32 %v3299_v37, %v2971_v33  ;;  %v3301_v39 = vpop.f32.mrb[6].mxu1 }
 0x56e   : > { %v3306_v41 = vmax.f32 %v4570_v36, 0.0  ;;  %v3302_v42 = vpop.f32.mrb[7].mxu1 }
 0x56f   : > { %v3307_v43 = vmax.f32 %v4571_v38, 0.0 }
 0x570   : > { %v3310_v50 = vpack.c.bf16 %v3306_v41, %v3306_v41 }
 0x571   : > { %v3311_v45 = vpack.c.bf16 %v3307_v43, %v3307_v43 }
 0x573   : > { %3781 = vmatprep.mubr.bf16.mxu0 %v3311_v45 }
 0x574   : > { %3782 = vmatmul.mubr.bf16.vlgmr.msra.gmra.mrb[4].mxu0 %v3310_v50 }
 0x647   : > { %v3783_v18 = vpop.f32.mrb[4].mxu0 }
 0x648   : > { %v4572_v51 = vadd.f32 %v3783_v18, %v3701_v32  ;;  %v3785_v44 = vpop.f32.mrb[5].mxu0 }
 0x649   : > { %v4573_v53 = vadd.f32 %v3785_v44, %v3705_v49  ;;  %v3787_v54 = vpop.f32.mrb[6].mxu0 }
 0x64a   : > { %v3790_v55 = vmax.f32 %v4572_v51, 0.0  ;;  %v3788_v62 = vpop.f32.mrb[7].mxu0 }
 0x64b   : > { %v3791_v56 = vmax.f32 %v4573_v53, 0.0 }
 0x64c   : > { %v3792_v58 = vpack.c.bf16 %v3790_v55, %v3790_v55 }
 0x64d   : > { %v3793_v57 = vpack.c.bf16 %v3791_v56, %v3791_v56 }
 0x64f   : > { %3955 = vmatprep.mubr.bf16.mxu1 %v3793_v57 }
 0x650   : > { %3956 = vmatmul.mubr.bf16.vlgmr.msra.gmra.mrb[8].mxu1 %v3792_v58 }
 0x723   : > { %v4542_v59 = vpop.f32.mrb[8].mxu1 }
 0x724   : > { %v4543_v19 = vpop.f32.mrb[9].mxu1 }
 0x725   : > { %v4544_v48 = vadd.f32 %v4543_v19, %v4542_v59  ;;  %v4545_v60 = vpop.f32.mrb[10].mxu1 }
 0x726   : > { %v4546_v61 = vpop.f32.mrb[11].mxu1 }
 0x727   : > { %v3958_v35 = vadd.f32 %v4544_v48, %v3826_v4 }
 0x729   : > { %3963 = vst [vmem:[%s5721_s17] sm:$0x1] %v3958_v35 }
 0x72a PF: > { %s5946_s23 = sld [smem:[#allocation22_spill]]  ;;  %s4516_s20 = sshll.u32 %s5432_s29, 4 }
 0x72b   : > { %s5947_s24 = sld [smem:[#allocation29_spill]]  ;;  %s3977_s28 = sshll.u32 %s5721_s17, 4  ;;  %s3978_s28 = int_to_ptr.vmem [resolvable:$true] %s3977_s28 }
 0x72c   : > { %s3965_s14 = scalar_lea.sflag [#allocation5], %s513_s30  ;;  %s5338_s16 = scalar_lea.vmem %s3978_s28, 16 }
 0x72d   : > { %p5339_p1 = scmp.ne.s32.totalorder %s3978_s28, %s5338_s16  ;;  %s5464_s19 = smov [#allocation11]  }
 0x72e   : > { %s5342_s25 = sshll.u32 %s5464_s19, 4  ;;  %s5343_s25 = int_to_ptr.vmem [resolvable:$false] %s5342_s25 }
 0x72f   : > { %s5344_s22 = scalar_lea.vmem %s5343_s25, 32  ;;  %p5345_p7 = scmp.lt.s32.totalorder %s3978_s28, %s5343_s25 }
 0x730   : > { %p5948_p4 = scmp.ne.s32.totalorder %s5946_s23, 0  ;;  %p5346_p8 = scmp.lt.s32.totalorder %s5344_s22, %s5338_s16 }
 0x731   : > { %s5842_s18 = scalar_lea.hbm %s5947_s24, %s4516_s20 }
 0x732   : > { %p5340_p5 = pnand %p5339_p1, %p5948_p4  ;;  %p5347_p11 = por %p5346_p8, %p5345_p7 }
 0x734   : > { %p5341_p6 = pneg %p5340_p5 }
 0x736   : > { %p5348_p12 = pnand %p5347_p11, %p5341_p6 }
 0x738   : > { %5351 = shalt.err (!%p5348_p12)
}
 0x739   : > { %s5352_s29 = scalar_lea.hbm %s5842_s18, 16  ;;  %s5356_s21 = scalar_lea.hbm %s5947_s24, 32 }
 0x73a   : > { %p5353_p3 = scmp.ne.s32.totalorder %s5842_s18, %s5352_s29  ;;  %p5357_p2 = scmp.lt.u32.totalorder %s5842_s18, %s5947_s24 }
 0x73b   : > { %p5358_p10 = scmp.lt.u32.totalorder %s5356_s21, %s5352_s29  ;;  %p5360_p1 = scmp.lt.u32.totalorder %s5352_s29, %s5842_s18 }
 0x73c   : > { %p5354_p9 = pnand %p5353_p3, %p5948_p4 }
 0x73d   : > { %p5359_p13 = por %p5358_p10, %p5357_p2 }
 0x73e   : > { %p5355_p0 = pneg %p5354_p9 }
 0x73f   : > { %p5361_p5 = por %p5360_p1, %p5359_p13 }
 0x741   : > { %p5362_p6 = pnand %p5361_p5, %p5355_p0 }
 0x743   : > { %5365 = shalt.err (!%p5362_p6)
}
 0x744   : > { %4615 = dma.vmem_to_hbm [thread:$0]  (%p5948_p4), %s3978_s28, 16, %s5842_s18, %s3965_s14  }
 0x745 PF: > { %s5949_s8 = sld [smem:[#allocation20_spill]]  ;;  %s5950_s10 = sld [smem:[#allocation16_spill]] }
 0x746   : > { %s5951_s20 = sld [smem:[#allocation24_spill]] }
 0x74b   : > { %p4642_p7 = scmp.ge.s32.totalorder %s5949_s8, 2  ;;  %s3989_s27 = sand.u32 1, %s5950_s10  }
 0x74c   : > { %p5952_p8 = scmp.ne.s32.totalorder %s5951_s20, 0  ;;  %s3990_s15 = scalar_lea.sflag [#allocation5], %s3989_s27 }
 0x74e   : > { %p4631_p11 = pnand %p4642_p7, %p5952_p8 }
 0x750   : > { %5411 = dma.done.wait (!%p4631_p11), %s3990_s15, 16  }
 0x751   : > { %5413 = vsyncadd (!%p4631_p11), %s3990_s15, 4294967280  ;;  %s29_s15 = sadd.s32 1, %s5949_s8   ;;  %s5953_s16 = sld [smem:[#allocation17_spill]] }
 0x752   : > { %p26_p12 = scmp.ge.s32.totalorder %s29_s15, 8   ;;  %s5954_s27 = sld [smem:[#allocation25_spill]] }
 0x753   : > { %s5955_s28 = sld [smem:[#allocation18_spill]]  ;;  %s5956_s29 = sld [smem:[#allocation19_spill]] }
 0x754   : > { %s5957_s30 = sld [smem:[#allocation21_spill]]  ;;  %s5958_s14 = sld [smem:[#allocation23_spill]] }
 0x755   : > { %s5959_s25 = smov %s5420_s26  ;;  %28 = sbr.rel (!%p26_p12) target bundleno = 13 (0xd), region = 132 }
 0x757   : > { %s5960_s26 = smov %s5953_s16 }
 0x75c   :  { %3994 = vsyncpa [#allocation4], 1 }
 0x75d   :  { %3996 = vsyncpa [#allocation4 + $0x1], 1 }
 0x75e   :  { %3997 = vsyncpa [#allocation7], 1 }
 0x75f   :  { %3998 = vsyncpa [#allocation10], 1 }
 0x760   :  { %3999 = vsyncpa [#allocation5], 1 }
 0x761   :  { %4001 = vsyncpa [#allocation5 + $0x1], 1 }

</bundles_post_ra>
